<compile_context>
chip_gen: v6e
topology: v6e:2x2x1
jax: 0.10.0
libtpu: 0.0.40
codegen_flags: <defaults>
</compile_context>

<pallas_src>
import numpy as np
import jax
import jax.numpy as jnp
from jax.experimental import pallas as pl
from jax.experimental.pallas import tpu as pltpu

K_TAPS = 4      # ConvTranspose1d kernel_size
STRIDE = 2
PAD = 1
BN_EPS = 1e-5
LANE = 128
SUBLANE = 8


def _round_up(a, m):
    return (a + m - 1) // m * m


def _vmem_limit_bytes():
    """3/4 of the chip's physical VMEM, capped at 100 MiB (safe on v5e/v6e/v7x)."""
    cap = 64 * 1024 * 1024          # conservative fallback = v7x physical VMEM
    try:
        cap = int(pltpu.get_tpu_info().vmem_capacity_bytes)
    except Exception:
        pass
    return min(cap * 3 // 4, 100 * 1024 * 1024)


# ----------------------------------------------------------------------------
# Host-side construction of the per-layer dense operators (exact conv-transpose)
# ----------------------------------------------------------------------------
def _convT_scatter_mats(s_in):
    """0/1 matrices U[k] with U[k][si, so] = 1 iff output position so receives
    tap k from input position si (so = si*stride - pad + k)."""
    s_out = (s_in - 1) * STRIDE - 2 * PAD + K_TAPS   # == 2 * s_in
    U = np.zeros((K_TAPS, s_in, s_out), np.float32)
    for si in range(s_in):
        for k in range(K_TAPS):
            so = si * STRIDE - PAD + k
            if 0 <= so < s_out:
                U[k, si, so] = 1.0
    return U, s_out


def _convT_dense(weight, s_in):
    """ConvTranspose1d(weight (C_in, C_out, K), stride=2, padding=1, no bias) as a
    dense matrix acting on channel-major flattened features:
        Mat[ci*S_in + si, co*S_out + so] = sum_k W[ci, co, k] * U[k][si, so]."""
    w = np.asarray(weight, np.float32)
    U, s_out = _convT_scatter_mats(s_in)
    mat = np.zeros((w.shape[0] * s_in, w.shape[1] * s_out), np.float32)
    for k in range(K_TAPS):
        mat += np.kron(w[:, :, k], U[k])
    return mat, s_out


def pack_params(conv_ws, bn_params, fc_w, fc_b, input_size):
    """Fold conv layers to dense operators, fold every eval-mode BN affine into the
    NEXT matrix (+ a bias row), pad lane dims to 128 (first K dim only to 8), and
    store the matrices in bf16 (biases stay f32)."""
    # 1) dense conv-transpose operators + per-feature BN affine (channel-major)
    mats, gains, shifts = [], [], []
    s = input_size
    for w, (gamma, beta, mean, var) in zip(conv_ws, bn_params):
        mat, s = _convT_dense(w, s)
        scale = np.asarray(gamma, np.float32) / np.sqrt(np.asarray(var, np.float32) + BN_EPS)
        shift = np.asarray(beta, np.float32) - np.asarray(mean, np.float32) * scale
        mats.append(mat)
        gains.append(np.repeat(scale, s).astype(np.float32))   # channel -> feature
        shifts.append(np.repeat(shift, s).astype(np.float32))
    mats.append(np.asarray(fc_w, np.float32).T)                # FC: (F4, n_classes)

    # 2) fold BN_l into M_{l+1}:  h_l = act_l*g_l + t_l
    #    => pre_{l+1} = act_l @ (diag(g_l) M_{l+1}) + (t_l @ M_{l+1})
    folded = [mats[0]]          # layer-1 matrix unchanged (no preceding BN)
    biases = []
    for l in range(4):
        m_next = mats[l + 1]
        folded.append(gains[l][:, None] * m_next)
        biases.append(shifts[l] @ m_next)
    biases[-1] = biases[-1] + np.asarray(fc_b, np.float32)     # FC bias folded in

    # 3) pad: first contraction dim only to sublane(8); feature dims to lane(128)
    dims = [input_size] + [m.shape[1] for m in folded]
    pdims = [_round_up(dims[0], SUBLANE)] + [_round_up(d, LANE) for d in dims[1:]]

    packed_mats = []
    for i, m in enumerate(folded):
        pm = np.zeros((pdims[i], pdims[i + 1]), np.float32)
        pm[: m.shape[0], : m.shape[1]] = m
        packed_mats.append(jnp.asarray(pm, jnp.bfloat16))      # bf16 weights

    packed_biases = []
    for i, b in enumerate(biases):
        pb = np.zeros((1, pdims[i + 2]), np.float32)
        pb[0, : b.shape[0]] = b
        packed_biases.append(jnp.asarray(pb))                  # f32 bias rows

    return packed_mats, packed_biases, pdims


# ----------------------------------------------------------------------------
# Fused Pallas kernel: 5-matmul chain (convs + FC), activations on the VPU/EUP
# ----------------------------------------------------------------------------
def conv_transpose1d_kernel(x_ref,
                            m1_ref,
                            m2_ref, b2_ref,
                            m3_ref, b3_ref,
                            m4_ref, b4_ref,
                            mfc_ref, bfc_ref,
                            o_ref):
    def mxu(a, m_ref):
        # bf16 operands on the MXU, f32 accumulation; elementwise math stays f32.
        return jnp.dot(a.astype(jnp.bfloat16), m_ref[...],
                       preferred_element_type=jnp.float32)

    # Layer 1: ConvT(1,dim) -> Sigmoid (BN1 affine is folded into m2/b2).
    # sigmoid(v) = 0.5*(tanh(0.5*v)+1): one EUP op instead of exp + divide.
    a = 0.5 * (jnp.tanh(0.5 * mxu(x_ref[...], m1_ref)) + 1.0)
    # Layers 2-4: ConvT -> ReLU, previous BN folded into matrix rows + bias row.
    a = jnp.maximum(mxu(a, m2_ref) + b2_ref[...], 0.0)
    a = jnp.maximum(mxu(a, m3_ref) + b3_ref[...], 0.0)
    a = jnp.maximum(mxu(a, m4_ref) + b4_ref[...], 0.0)
    # Flatten (already flat, channel-major) -> Linear; BN4 + FC bias folded in.
    o_ref[...] = (mxu(a, mfc_ref) + bfc_ref[...]).astype(o_ref.dtype)


def conv_transpose1d_forward(x, packed, n_classes, *, max_tm=256):
    """x: (B, T, input_size) f32 -> (B, T, n_classes) f32."""
    mats, biases, pdims = packed
    B, T, S0 = x.shape
    M = B * T

    # Row tiling: aim for >= 2 grid steps (both v7x TCs busy), up to max_tm rows
    # per step for large M; zero-padded tail, no divisibility assert.
    tm = max(SUBLANE, min(max_tm, _round_up(-(-M // 2), SUBLANE)))
    m_pad = _round_up(M, tm)

    # Pad rows to m_pad and the tiny K dim only to the sublane multiple (no 128-pad,
    # no zeros().at[].set() round-trip).
    x2d = jnp.pad(x.reshape(M, S0).astype(jnp.float32),
                  ((0, m_pad - M), (0, pdims[0] - S0)))

    row = lambda i: (i, 0)      # activations: tiled over sample rows
    rep = lambda i: (0, 0)      # weights / biases: same block every step (resident)
    resident = dict(pipeline_mode=pl.Buffered(1))   # single buffer for constants

    m1, m2, m3, m4, mfc = mats
    b2, b3, b4, bfc = biases

    in_specs = [pl.BlockSpec((tm, pdims[0]), row)]
    operands = [x2d]
    for mat, bias in ((m1, None), (m2, b2), (m3, b3), (m4, b4), (mfc, bfc)):
        in_specs.append(pl.BlockSpec(mat.shape, rep, **resident))
        operands.append(mat)
        if bias is not None:
            in_specs.append(pl.BlockSpec(bias.shape, rep, **resident))
            operands.append(bias)

    out2d = pl.pallas_call(
        conv_transpose1d_kernel,
        out_shape=jax.ShapeDtypeStruct((m_pad, pdims[-1]), jnp.float32),
        grid_spec=pltpu.PrefetchScalarGridSpec(
            num_scalar_prefetch=0,
            grid=(m_pad // tm,),
            in_specs=in_specs,
            out_specs=pl.BlockSpec((tm, pdims[-1]), row),   # lane-dense (128) stores
        ),
        compiler_params=pltpu.CompilerParams(
            dimension_semantics=("parallel",),
            vmem_limit_bytes=_vmem_limit_bytes(),
        ),
    )(*operands)

    return out2d[:M, :n_classes].reshape(B, T, n_classes)


# ----------------------------------------------------------------------------
# Independent pure-JAX reference (direct ConvTranspose1d scatter definition, f32)
# ----------------------------------------------------------------------------
def _convT1d_ref(x, w):
    """x: (N, C_in, S), w: (C_in, C_out, K); PyTorch ConvTranspose1d, s=2, p=1."""
    N, c_in, s_in = x.shape
    c_out = w.shape[1]
    s_out = (s_in - 1) * STRIDE - 2 * PAD + K_TAPS
    y = jnp.zeros((N, c_out, s_out), jnp.float32)
    for k in range(K_TAPS):
        t = np.arange(s_in) * STRIDE - PAD + k
        idx = np.nonzero((t >= 0) & (t < s_out))[0]
        contrib = jnp.einsum('nis,io->nos', x, w[:, :, k],
                             precision=jax.lax.Precision.HIGHEST)
        y = y.at[:, :, t[idx]].add(contrib[:, :, idx])
    return y


def reference_forward(x, conv_ws, bn_params, fc_w, fc_b):
    B, T, S0 = x.shape
    h = x.reshape(B * T, 1, S0).astype(jnp.float32)
    acts = [jax.nn.sigmoid, jax.nn.relu, jax.nn.relu, jax.nn.relu]
    for act, w, (gamma, beta, mean, var) in zip(acts, conv_ws, bn_params):
        h = _convT1d_ref(h, w)
        h = act(h)
        inv = gamma / jnp.sqrt(var + BN_EPS)
        h = (h - mean[None, :, None]) * inv[None, :, None] + beta[None, :, None]
    feat = h.reshape(B * T, -1)                      # nn.Flatten (channel-major)
    out = jnp.dot(feat, fc_w.T, precision=jax.lax.Precision.HIGHEST) + fc_b
    return out.reshape(B, T, -1)


# ----------------------------------------------------------------------------
# Deterministic synthetic parameters (PyTorch-like init, nontrivial BN stats)
# ----------------------------------------------------------------------------
def init_model_params(key, input_size, dim, n_classes):
    half = dim // 2
    conv_shapes = [(1, dim), (dim, dim), (dim, half), (half, half)]
    conv_ws, bn_params = [], []
    for c_in, c_out in conv_shapes:
        key, kw, kg, kb, km, kv = jax.random.split(key, 6)
        bound = 1.0 / np.sqrt(c_in * K_TAPS)
        conv_ws.append(jax.random.uniform(kw, (c_in, c_out, K_TAPS),
                                          jnp.float32, -bound, bound))
        bn_params.append((
            jax.random.uniform(kg, (c_out,), jnp.float32, 0.5, 1.5),    # gamma
            jax.random.uniform(kb, (c_out,), jnp.float32, -0.3, 0.3),   # beta
            jax.random.uniform(km, (c_out,), jnp.float32, -0.3, 0.3),   # running_mean
            jax.random.uniform(kv, (c_out,), jnp.float32, 0.5, 1.5),    # running_var
        ))
    fc_in = 16 * half * input_size
    key, kw, kb = jax.random.split(key, 3)
    bound = 1.0 / np.sqrt(fc_in)
    fc_w = jax.random.uniform(kw, (n_classes, fc_in), jnp.float32, -bound, bound)
    fc_b = jax.random.uniform(kb, (n_classes,), jnp.float32, -bound, bound)
    return conv_ws, bn_params, fc_w, fc_b


if __name__ == "__main__":
    # Small shapes implied by forward(): batch=2, transmission_length=8,
    # input_size=8, dim=16, n_classes=10.
    batch, seq, input_size, dim, n_classes = 2, 8, 8, 16, 10

    key = jax.random.PRNGKey(0)
    key, kx = jax.random.split(key)
    x = jax.random.normal(kx, (batch, seq, input_size), jnp.float32)

    conv_ws, bn_params, fc_w, fc_b = init_model_params(key, input_size, dim, n_classes)
    packed = pack_params(conv_ws, bn_params, fc_w, fc_b, input_size)

    out = conv_transpose1d_forward(x, packed, n_classes)
    out = jax.block_until_ready(out)
    assert out.shape == (batch, seq, n_classes)

    ref = reference_forward(x, conv_ws, bn_params, fc_w, fc_b)
    # bf16 folded operators vs an f32 HIGHEST-precision reference -> slightly looser
    # tolerance than a pure-f32 kernel would need.
    err = float(jnp.max(jnp.abs(out - ref)))
    assert jnp.allclose(out, ref, atol=5e-2, rtol=5e-2), (
        f"mismatch vs reference: max abs diff = {err}")

    print("KERNEL_OK")
</pallas_src>

<mosaic_0001>
module attributes {stable_mosaic.version = 11 : i64} {
  func.func @conv_transpose1d_kernel(%arg0: i32, %arg1: memref<8x8xf32, #tpu.memory_space<vmem>>, %arg2: memref<8x256xbf16, #tpu.memory_space<vmem>>, %arg3: memref<256x512xbf16, #tpu.memory_space<vmem>>, %arg4: memref<1x512xf32, #tpu.memory_space<vmem>>, %arg5: memref<512x512xbf16, #tpu.memory_space<vmem>>, %arg6: memref<1x512xf32, #tpu.memory_space<vmem>>, %arg7: memref<512x1024xbf16, #tpu.memory_space<vmem>>, %arg8: memref<1x1024xf32, #tpu.memory_space<vmem>>, %arg9: memref<1024x128xbf16, #tpu.memory_space<vmem>>, %arg10: memref<1x128xf32, #tpu.memory_space<vmem>>, %arg11: memref<8x128xf32, #tpu.memory_space<vmem>>) attributes {dimension_semantics = [#tpu.dimension_semantics<parallel>], iteration_bounds = array<i64: 2>, scalar_prefetch = 0 : i64, scratch_operands = 0 : i64, tpu.core_type = #tpu.core_type<tc>, window_params = [{transform_indices = @transform_0, window_bounds = array<i64: 8, 8>}, {pipeline_mode = #tpu.pipeline_mode<synchronous>, transform_indices = @transform_1, window_bounds = array<i64: 8, 256>}, {pipeline_mode = #tpu.pipeline_mode<synchronous>, transform_indices = @transform_2, window_bounds = array<i64: 256, 512>}, {pipeline_mode = #tpu.pipeline_mode<synchronous>, transform_indices = @transform_3, window_bounds = array<i64: 1, 512>}, {pipeline_mode = #tpu.pipeline_mode<synchronous>, transform_indices = @transform_4, window_bounds = array<i64: 512, 512>}, {pipeline_mode = #tpu.pipeline_mode<synchronous>, transform_indices = @transform_5, window_bounds = array<i64: 1, 512>}, {pipeline_mode = #tpu.pipeline_mode<synchronous>, transform_indices = @transform_6, window_bounds = array<i64: 512, 1024>}, {pipeline_mode = #tpu.pipeline_mode<synchronous>, transform_indices = @transform_7, window_bounds = array<i64: 1, 1024>}, {pipeline_mode = #tpu.pipeline_mode<synchronous>, transform_indices = @transform_8, window_bounds = array<i64: 1024, 128>}, {pipeline_mode = #tpu.pipeline_mode<synchronous>, transform_indices = @transform_9, window_bounds = array<i64: 1, 128>}, {transform_indices = @transform_10, window_bounds = array<i64: 8, 128>}]} {
    %c0 = arith.constant 0 : index
    %c0_0 = arith.constant 0 : index
    %0 = vector.load %arg1[%c0, %c0_0] : memref<8x8xf32, #tpu.memory_space<vmem>>, vector<8x8xf32>
    %1 = arith.truncf %0 : vector<8x8xf32> to vector<8x8xbf16>
    %c0_1 = arith.constant 0 : index
    %c0_2 = arith.constant 0 : index
    %2 = vector.load %arg2[%c0_1, %c0_2] : memref<8x256xbf16, #tpu.memory_space<vmem>>, vector<8x256xbf16>
    %cst = arith.constant dense<0.000000e+00> : vector<8x256xf32>
    %3 = tpu.matmul %1, %2, %cst {dimension_numbers = #tpu.dot_dimension_numbers<[1], [0], [0], [1], [0, 0, 1, 1], [], []>} : vector<8x8xbf16>, vector<8x256xbf16>, vector<8x256xf32> -> vector<8x256xf32>
    %cst_3 = arith.constant 5.000000e-01 : f32
    %4 = vector.broadcast %cst_3 : f32 to vector<8x256xf32>
    %5 = arith.mulf %4, %3 : vector<8x256xf32>
    %6 = math.tanh %5 : vector<8x256xf32>
    %cst_4 = arith.constant 1.000000e+00 : f32
    %7 = vector.broadcast %cst_4 : f32 to vector<8x256xf32>
    %8 = arith.addf %6, %7 : vector<8x256xf32>
    %cst_5 = arith.constant 5.000000e-01 : f32
    %9 = vector.broadcast %cst_5 : f32 to vector<8x256xf32>
    %10 = arith.mulf %9, %8 : vector<8x256xf32>
    %11 = arith.truncf %10 : vector<8x256xf32> to vector<8x256xbf16>
    %c0_6 = arith.constant 0 : index
    %c0_7 = arith.constant 0 : index
    %12 = vector.load %arg3[%c0_6, %c0_7] : memref<256x512xbf16, #tpu.memory_space<vmem>>, vector<256x512xbf16>
    %cst_8 = arith.constant dense<0.000000e+00> : vector<8x512xf32>
    %13 = tpu.matmul %11, %12, %cst_8 {dimension_numbers = #tpu.dot_dimension_numbers<[1], [0], [0], [1], [0, 0, 1, 1], [], []>} : vector<8x256xbf16>, vector<256x512xbf16>, vector<8x512xf32> -> vector<8x512xf32>
    %c0_9 = arith.constant 0 : index
    %c0_10 = arith.constant 0 : index
    %14 = vector.load %arg4[%c0_9, %c0_10] : memref<1x512xf32, #tpu.memory_space<vmem>>, vector<1x512xf32>
    %15 = vector.broadcast %14 : vector<1x512xf32> to vector<8x512xf32>
    %16 = arith.addf %13, %15 : vector<8x512xf32>
    %cst_11 = arith.constant 0.000000e+00 : f32
    %17 = vector.broadcast %cst_11 : f32 to vector<8x512xf32>
    %18 = arith.maximumf %16, %17 : vector<8x512xf32>
    %19 = arith.truncf %18 : vector<8x512xf32> to vector<8x512xbf16>
    %c0_12 = arith.constant 0 : index
    %c0_13 = arith.constant 0 : index
    %20 = vector.load %arg5[%c0_12, %c0_13] : memref<512x512xbf16, #tpu.memory_space<vmem>>, vector<512x512xbf16>
    %cst_14 = arith.constant dense<0.000000e+00> : vector<8x512xf32>
    %21 = tpu.matmul %19, %20, %cst_14 {dimension_numbers = #tpu.dot_dimension_numbers<[1], [0], [0], [1], [0, 0, 1, 1], [], []>} : vector<8x512xbf16>, vector<512x512xbf16>, vector<8x512xf32> -> vector<8x512xf32>
    %c0_15 = arith.constant 0 : index
    %c0_16 = arith.constant 0 : index
    %22 = vector.load %arg6[%c0_15, %c0_16] : memref<1x512xf32, #tpu.memory_space<vmem>>, vector<1x512xf32>
    %23 = vector.broadcast %22 : vector<1x512xf32> to vector<8x512xf32>
    %24 = arith.addf %21, %23 : vector<8x512xf32>
    %cst_17 = arith.constant 0.000000e+00 : f32
    %25 = vector.broadcast %cst_17 : f32 to vector<8x512xf32>
    %26 = arith.maximumf %24, %25 : vector<8x512xf32>
    %27 = arith.truncf %26 : vector<8x512xf32> to vector<8x512xbf16>
    %c0_18 = arith.constant 0 : index
    %c0_19 = arith.constant 0 : index
    %28 = vector.load %arg7[%c0_18, %c0_19] : memref<512x1024xbf16, #tpu.memory_space<vmem>>, vector<512x1024xbf16>
    %cst_20 = arith.constant dense<0.000000e+00> : vector<8x1024xf32>
    %29 = tpu.matmul %27, %28, %cst_20 {dimension_numbers = #tpu.dot_dimension_numbers<[1], [0], [0], [1], [0, 0, 1, 1], [], []>} : vector<8x512xbf16>, vector<512x1024xbf16>, vector<8x1024xf32> -> vector<8x1024xf32>
    %c0_21 = arith.constant 0 : index
    %c0_22 = arith.constant 0 : index
    %30 = vector.load %arg8[%c0_21, %c0_22] : memref<1x1024xf32, #tpu.memory_space<vmem>>, vector<1x1024xf32>
    %31 = vector.broadcast %30 : vector<1x1024xf32> to vector<8x1024xf32>
    %32 = arith.addf %29, %31 : vector<8x1024xf32>
    %cst_23 = arith.constant 0.000000e+00 : f32
    %33 = vector.broadcast %cst_23 : f32 to vector<8x1024xf32>
    %34 = arith.maximumf %32, %33 : vector<8x1024xf32>
    %35 = arith.truncf %34 : vector<8x1024xf32> to vector<8x1024xbf16>
    %c0_24 = arith.constant 0 : index
    %c0_25 = arith.constant 0 : index
    %36 = vector.load %arg9[%c0_24, %c0_25] : memref<1024x128xbf16, #tpu.memory_space<vmem>>, vector<1024x128xbf16>
    %cst_26 = arith.constant dense<0.000000e+00> : vector<8x128xf32>
    %37 = tpu.matmul %35, %36, %cst_26 {dimension_numbers = #tpu.dot_dimension_numbers<[1], [0], [0], [1], [0, 0, 1, 1], [], []>} : vector<8x1024xbf16>, vector<1024x128xbf16>, vector<8x128xf32> -> vector<8x128xf32>
    %c0_27 = arith.constant 0 : index
    %c0_28 = arith.constant 0 : index
    %38 = vector.load %arg10[%c0_27, %c0_28] : memref<1x128xf32, #tpu.memory_space<vmem>>, vector<1x128xf32>
    %39 = vector.broadcast %38 : vector<1x128xf32> to vector<8x128xf32>
    %40 = arith.addf %37, %39 : vector<8x128xf32>
    %c0_29 = arith.constant 0 : index
    %c0_30 = arith.constant 0 : index
    %41 = vector.load %arg11[%c0_29, %c0_30] : memref<8x128xf32, #tpu.memory_space<vmem>>, vector<8x128xf32>
    tpu.vector_store %arg11[%c0_29, %c0_30], %40 {strides = array<i32>} : memref<8x128xf32, #tpu.memory_space<vmem>>, vector<8x128xf32>,
    return
  }
  func.func @transform_0(%arg0: i32) -> (i32, i32) {
    %c0_i32 = arith.constant 0 : i32
    %c0_i32_0 = arith.constant 0 : i32
    return %arg0, %c0_i32 : i32, i32
  }
  func.func @transform_1(%arg0: i32) -> (i32, i32) {
    %c0_i32 = arith.constant 0 : i32
    %c0_i32_0 = arith.constant 0 : i32
    %c0_i32_1 = arith.constant 0 : i32
    return %c0_i32, %c0_i32_0 : i32, i32
  }
  func.func @transform_2(%arg0: i32) -> (i32, i32) {
    %c0_i32 = arith.constant 0 : i32
    %c0_i32_0 = arith.constant 0 : i32
    %c0_i32_1 = arith.constant 0 : i32
    return %c0_i32, %c0_i32_0 : i32, i32
  }
  func.func @transform_3(%arg0: i32) -> (i32, i32) {
    %c0_i32 = arith.constant 0 : i32
    %c0_i32_0 = arith.constant 0 : i32
    %c0_i32_1 = arith.constant 0 : i32
    return %c0_i32, %c0_i32_0 : i32, i32
  }
  func.func @transform_4(%arg0: i32) -> (i32, i32) {
    %c0_i32 = arith.constant 0 : i32
    %c0_i32_0 = arith.constant 0 : i32
    %c0_i32_1 = arith.constant 0 : i32
    return %c0_i32, %c0_i32_0 : i32, i32
  }
  func.func @transform_5(%arg0: i32) -> (i32, i32) {
    %c0_i32 = arith.constant 0 : i32
    %c0_i32_0 = arith.constant 0 : i32
    %c0_i32_1 = arith.constant 0 : i32
    return %c0_i32, %c0_i32_0 : i32, i32
  }
  func.func @transform_6(%arg0: i32) -> (i32, i32) {
    %c0_i32 = arith.constant 0 : i32
    %c0_i32_0 = arith.constant 0 : i32
    %c0_i32_1 = arith.constant 0 : i32
    return %c0_i32, %c0_i32_0 : i32, i32
  }
  func.func @transform_7(%arg0: i32) -> (i32, i32) {
    %c0_i32 = arith.constant 0 : i32
    %c0_i32_0 = arith.constant 0 : i32
    %c0_i32_1 = arith.constant 0 : i32
    return %c0_i32, %c0_i32_0 : i32, i32
  }
  func.func @transform_8(%arg0: i32) -> (i32, i32) {
    %c0_i32 = arith.constant 0 : i32
    %c0_i32_0 = arith.constant 0 : i32
    %c0_i32_1 = arith.constant 0 : i32
    return %c0_i32, %c0_i32_0 : i32, i32
  }
  func.func @transform_9(%arg0: i32) -> (i32, i32) {
    %c0_i32 = arith.constant 0 : i32
    %c0_i32_0 = arith.constant 0 : i32
    %c0_i32_1 = arith.constant 0 : i32
    return %c0_i32, %c0_i32_0 : i32, i32
  }
  func.func @transform_10(%arg0: i32) -> (i32, i32) {
    %c0_i32 = arith.constant 0 : i32
    %c0_i32_0 = arith.constant 0 : i32
    return %arg0, %c0_i32 : i32, i32
  }
}

</mosaic_0001>

<bundles_post_ra>
// kernel: tpu_custom_call.1
= control target key start
LH: loop header
LB: loop body
LE: loop exit
PB: predicated region body
PF: predicated region fallthrough
CT: control target
= control target key end

     0   :  { %15 = vsyncpa [#allocation3], 0  ;;  %s6253_s0 = inlined_call_operand.vmem [shape: f32[16,8], index: 0, kind: input, shape index: {}]   ;;  %s6254_s1 = inlined_call_operand.vmem [shape: bf16[8,256], index: 1, kind: input, shape index: {}]   ;;  %s6255_s2 = inlined_call_operand.hbm [shape: bf16[256,512], index: 2, kind: input, shape index: {}]   ;;  %s6256_s3 = inlined_call_operand.vmem [shape: f32[1,512], index: 3, kind: input, shape index: {}]   ;;  %s6257_s4 = inlined_call_operand.hbm [shape: bf16[512,512], index: 4, kind: input, shape index: {}]   ;;  %s6258_s5 = inlined_call_operand.vmem [shape: f32[1,512], index: 5, kind: input, shape index: {}]   ;;  %s6259_s6 = inlined_call_operand.hbm [shape: bf16[512,1024], index: 6, kind: input, shape index: {}]   ;;  %s6260_s7 = inlined_call_operand.vmem [shape: f32[1,1024], index: 7, kind: input, shape index: {}]   ;;  %s6261_s8 = inlined_call_operand.hbm [shape: bf16[1024,128], index: 8, kind: input, shape index: {}]   ;;  %s6262_s9 = inlined_call_operand.vmem [shape: f32[1,128], index: 9, kind: input, shape index: {}]   ;;  %s6263_s10 = inlined_call_operand.hbm [shape: f32[16,128], index: 10, kind: output, shape index: {}]  }
   0x1   :  { %16 = vsyncpa [#allocation6], 0 }
   0x2   :  { %17 = vsyncpa [#allocation9], 0 }
   0x3   :  { %18 = vsyncpa [#allocation4], 0 }
   0x4   :  { %20 = vsyncpa [#allocation4 + $0x1], 0  ;;  %s5972_s13 = smov 0   ;;  %s5974_s14 = smov 0  }
   0x5   :  { %s5976_s15 = smov 0   ;;  %s5978_s16 = smov 0  }
   0x6 LB: > { %s5993_s17 = sadd.s32 4294967295, %s5903_s16   ;;  %s4659_s18 = sadd.s32 4294967294, %s5903_s16   ;;  %s5903_s16 = sphi %s5978_s16, %s6283_s16   ;;  %s5899_s15 = sphi %s5976_s15, %s6282_s15   ;;  %s5895_s14 = sphi %s5974_s14, %s6281_s14   ;;  %s5891_s13 = sphi %s5972_s13, %s6280_s13  }
   0x7   : > { %s5997_s19 = sadd.s32 1, %s5903_s16   ;;  %s248_s20 = sadd.s32 1, %s5899_s15 }
   0x8   : > { %s245_s21 = ssub.s32 %s5903_s16, %s5997_s19  ;;  %p258_p0 = scmp.ne.s32.totalorder %s5899_s15, %s5895_s14 }
   0x9   : > { %p246_p1 = scmp.eq.s32.totalorder %s245_s21, 0  ;;  %p259_p2 = scmp.eq.s32.totalorder %s5993_s17, 1 }
   0xa   : > { %p264_p3 = scmp.ne.s32.totalorder %s5895_s14, %s5891_s13  ;;  %p265_p4 = scmp.eq.s32.totalorder %s4659_s18, 1 }
   0xb   : > { %s6008_s22 = scalar_select %p246_p1, %s5899_s15, %s248_s20  }
   0xc   : > { %p6010_p5 = por %p259_p2, %p258_p0  ;;  %p6014_p6 = por %p265_p4, %p264_p3 }
   0xd   : > { %6266 = sst [smem:[#allocation15_spill]] %s6008_s22  ;;  %p4660_p7 = scmp.ge.s32.totalorder %s5903_s16, 1 }
   0xe   : > { %s6267_s23 = scalar_select %p6010_p5, 1, 0 }
   0xf   : > { %s6268_s24 = scalar_select %p6014_p6, 1, 0 }
  0x10   : > { %p272_p8 = scmp.lt.s32.totalorder %s5903_s16, 3  ;;  %p6264_p9 = scmp.eq.s32.totalorder %s5993_s17, 0 }
  0x11   : > { %s5905_s26 = smov [#allocation5]   ;;  %s5906_s29 = smov [#allocation2]  }
  0x12   : > { %p6021_p10 = pnand %p4660_p7, %p272_p8  ;;  %s303_s27 = sshll.u32 %s5905_s26, 4  ;;  %s304_s27 = int_to_ptr.vmem [resolvable:$true] %s303_s27 }
  0x13   : > { %s287_s30 = sshll.u32 %s5906_s29, 4  ;;  %s5907_s11 = smov [#allocation7]   ;;  %s288_s30 = int_to_ptr.vmem [resolvable:$true] %s287_s30 }
  0x14   : > { %p5300_p11 = pneg %p6021_p10  ;;  %s319_s12 = sshll.u32 %s5907_s11, 4  ;;  %s320_s12 = int_to_ptr.vmem [resolvable:$true] %s319_s12 }
  0x15   : > { %s5738_s18 = scalar_lea.vmem %s304_s27, 16384  ;;  %p5746_p3 = scmp.lt.s32.totalorder %s304_s27, %s304_s27 }
  0x16   : > { %p6029_p12 = pnand %p6264_p9, %p5300_p11  ;;  %p5739_p0 = scmp.ne.s32.totalorder %s304_s27, %s5738_s18 }
  0x17   : > { %p5747_p4 = scmp.lt.s32.totalorder %s5738_s18, %s5738_s18 }
  0x18   : > { %p5729_p13 = pneg %p6029_p12 }
  0x19   : > { %p5748_p7 = por %p5747_p4, %p5746_p3 }
  0x1a   : > { %p5741_p1 = pnand %p5739_p0, %p5729_p13 }
  0x1c   : > { %p5742_p2 = pneg %p5741_p1 }
  0x1e   : > { %p5749_p8 = pnand %p5748_p7, %p5742_p2 }
  0x20   : > { %5752 = shalt.err (!%p5749_p8)
}
  0x21   : > { %s5908_s20 = smov 256   ;;  %s5909_s21 = smov 16  }
  0x22   : > { %5306 = dma.hbm_to_vmem [thread:$0]  (!%p6029_p12), %s6257_s4, 16384, %s304_s27, [#allocation6], %s5908_s20, %s5908_s20, %s5909_s21  }
  0x23   : > { %s5764_s11 = scalar_lea.vmem %s288_s30, 8192  ;;  %p5772_p9 = scmp.lt.s32.totalorder %s288_s30, %s288_s30 }
  0x24   : > { %p5765_p11 = scmp.ne.s32.totalorder %s288_s30, %s5764_s11  ;;  %p5773_p6 = scmp.lt.s32.totalorder %s5764_s11, %s5764_s11 }
  0x26   : > { %p5767_p0 = pnand %p5765_p11, %p5729_p13  ;;  %p5774_p3 = por %p5773_p6, %p5772_p9 }
  0x28   : > { %p5768_p1 = pneg %p5767_p0 }
  0x2a   : > { %p5775_p2 = pnand %p5774_p3, %p5768_p1 }
  0x2c   : > { %5778 = shalt.err (!%p5775_p2)
}
  0x2d   : > { %5303 = dma.hbm_to_vmem [thread:$0]  (!%p6029_p12), %s6255_s2, 8192, %s288_s30, [#allocation3], %s5908_s20, %s5908_s20, %s5909_s21  }
  0x2e   : > { %s5790_s27 = scalar_lea.vmem %s320_s12, 32768  ;;  %p5798_p11 = scmp.lt.s32.totalorder %s320_s12, %s320_s12 }
  0x2f   : > { %p5791_p4 = scmp.ne.s32.totalorder %s320_s12, %s5790_s27  ;;  %p5799_p0 = scmp.lt.s32.totalorder %s5790_s27, %s5790_s27 }
  0x31   : > { %p5793_p7 = pnand %p5791_p4, %p5729_p13  ;;  %p5800_p5 = por %p5799_p0, %p5798_p11 }
  0x33   : > { %p5794_p8 = pneg %p5793_p7 }
  0x35   : > { %p5801_p6 = pnand %p5800_p5, %p5794_p8 }
  0x37   : > { %5804 = shalt.err (!%p5801_p6)
}
  0x38   : > { %s5910_s26 = smov 512   ;;  %s5911_s29 = smov 32  }
  0x39   : > { %5309 = dma.hbm_to_vmem [thread:$0]  (!%p6029_p12), %s6259_s6, 32768, %s320_s12, [#allocation6], %s5910_s26, %s5910_s26, %s5911_s29  }
  0x3a   : > { %s5912_s30 = smov [#allocation8]  }
  0x3b   : > { %s335_s20 = sshll.u32 %s5912_s30, 4  ;;  %s336_s20 = int_to_ptr.vmem [resolvable:$true] %s335_s20 }
  0x3c   : > { %s5816_s21 = scalar_lea.vmem %s336_s20, 8192  ;;  %p5824_p5 = scmp.lt.s32.totalorder %s336_s20, %s336_s20 }
  0x3d   : > { %p5817_p9 = scmp.ne.s32.totalorder %s336_s20, %s5816_s21  ;;  %p5825_p2 = scmp.lt.s32.totalorder %s5816_s21, %s5816_s21 }
  0x3f   : > { %p5819_p1 = pnand %p5817_p9, %p5729_p13  ;;  %p5826_p4 = por %p5825_p2, %p5824_p5 }
  0x41   : > { %p5820_p3 = pneg %p5819_p1 }
  0x43   : > { %p5827_p7 = pnand %p5826_p4, %p5820_p3 }
  0x45   : > { %5830 = shalt.err (!%p5827_p7)
}
  0x46   : > { %s5913_s18 = smov 64   ;;  %s5914_s27 = smov 4  }
  0x47   : > { %5312 = dma.hbm_to_vmem [thread:$0]  (!%p6029_p12), %s6261_s8, 8192, %s336_s20, [#allocation9], %s5913_s18, %s5913_s18, %s5914_s27  }
  0x48   : > { %361 = sbr.rel (%p6021_p10) target bundleno = 1388 (0x56c), region = 60  ;;  %p6271_p8 = scmp.eq.s32.totalorder (!%p6021_p10), %s5993_s17, 0 }
  0x4d   : > { %5874 = dma.done.wait (%p6271_p8), [#allocation3], 8192   ;;  %p6272_p13 = pmov %p6271_p8 }
  0x4e   : > { %p6273_p11 = pmov %p6271_p8 }
  0x4f   : > { %5876 = vsyncadd (%p6272_p13), [#allocation3], 4294959104 }
  0x50   : > { %5878 = dma.done.wait (%p6273_p11), [#allocation6], 49152   ;;  %p6274_p0 = pmov %p6271_p8 }
  0x52   : > { %5880 = vsyncadd (%p6274_p0), [#allocation6], 4294918144  ;;  %p6275_p6 = pmov %p6274_p0 }
  0x53   : > { %p6276_p12 = pmov %p6274_p0 }
  0x54   : > { %5882 = dma.done.wait (%p6275_p6), [#allocation9], 8192  }
  0x55   : > { %5884 = vsyncadd (%p6276_p12), [#allocation9], 4294959104  ;;  %p410_p10 = scmp.lt.s32.totalorder %s5993_s17, 1  ;;  %v5915_v0 = vmov 0   ;;  %v417_v1 = vld [vmem:[%s6254_s1] sm:$0xff]  ;;  %vm427_vm0 = vcmask 1043456  }
  0x56   : > { %466 = vmatprep.mubr.bf16.mxu0 %v5915_v0  ;;  %v4674_v3 = vcombine.high %v417_v1, %v417_v1  ;;  %v4673_v4 = vcombine.low %v417_v1, %v417_v1  ;;  %v5371_v5 = vld [vmem:[#allocation2 + $0xe4] ss:$16 sps:$4 sm:$0xff]   ;;  %v5373_v6 = vld [vmem:[#allocation2 + $0xe8] ss:$16 sps:$4 sm:$0xff]   ;;  %v5375_v7 = vld [vmem:[#allocation2 + $0xec] ss:$16 sps:$4 sm:$0xff]  }
  0x57   : > { %s411_s25 = scalar_select %p410_p10, %s5993_s17, 1  ;;  %891 = vmatprep.subr.bf16.mxu1 %v5371_v5  ;;  %v5376_v10 = vld [vmem:[#allocation2 + $0xe0] ss:$16 sps:$4 sm:$0xff]   ;;  %vm423_vm1 = vcmask 64512   ;;  %v5377_v11 = vld [vmem:[#allocation2 + $0xc4] ss:$16 sps:$4 sm:$0xff]  }
  0x58   : > { %4675 = vmatprep.subr.msk.bf16.mxu0 %vm427_vm0, %v4674_v3  ;;  %v429_v8 = vsel %vm427_vm0, %v4673_v4, 0  ;;  %892 = vmatpush1.bf16.msra.mxu1 %v5376_v10  ;;  %v5381_v12 = vld [vmem:[#allocation2 + $0xcc] ss:$16 sps:$4 sm:$0xff]   ;;  %v5382_v13 = vld [vmem:[#allocation2 + $0xc0] ss:$16 sps:$4 sm:$0xff]   ;;  %s407_s29 = sand.u32 1, %s5895_s14  }
  0x59   : > { %s4672_s28 = sshll.u32 %s411_s25, 3  ;;  %449 = vmatpush1.bf16.msra.mxu0 %v429_v8  ;;  %893 = vmatprep.subr.bf16.mxu1 %v5377_v11  ;;  %v5383_v14 = vld [vmem:[#allocation2 + $0xa4] ss:$16 sps:$4 sm:$0xff]   ;;  %v5379_v15 = vld [vmem:[#allocation2 + $0xc8] ss:$16 sps:$4 sm:$0xff]   ;;  %s5191_s30 = sshll.u32 %s5993_s17, 7 }
  0x5a   : > { %s413_s11 = scalar_lea.vmem %s6253_s0, %s4672_s28  ;;  %932 = vmatprep.subr.bf16.mxu0 %v5375_v7  ;;  %v5387_v16 = vld [vmem:[#allocation2 + $0xac] ss:$16 sps:$4 sm:$0xff]   ;;  %v5388_v17 = vld [vmem:[#allocation2 + $0xa0] ss:$16 sps:$4 sm:$0xff]   ;;  %v5389_v18 = vld [vmem:[#allocation2 + $0x84] ss:$16 sps:$4 sm:$0xff]   ;;  %s6218_s22 = scalar_lea.hbm %s6263_s10, %s5191_s30 }
  0x5b   : > { %v415_v2 = vld [vmem:[%s413_s11] sm:$0xff]  ;;  %v5385_v19 = vld [vmem:[#allocation2 + $0xa8] ss:$16 sps:$4 sm:$0xff]   ;;  %v5393_v20 = vld [vmem:[#allocation2 + $0x8c] ss:$16 sps:$4 sm:$0xff]   ;;  %s4671_s11 = sshll.u32 %s407_s29, 3 }
  0x5c   : > { %v416_v9 = vpack.c.bf16 %v415_v2, %v415_v2  ;;  %894 = vmatpush1.bf16.msra.mxu1 %v5382_v13  ;;  %v5394_v21 = vld [vmem:[#allocation2 + $0x80] ss:$16 sps:$4 sm:$0xff]   ;;  %v5395_v22 = vld [vmem:[#allocation2 + $0x64] ss:$16 sps:$4 sm:$0xff]   ;;  %v5391_v23 = vld [vmem:[#allocation2 + $0x88] ss:$16 sps:$4 sm:$0xff]  }
  0x5d   : > { %895 = vmatprep.subr.bf16.mxu1 %v5383_v14  ;;  %v5399_v24 = vld [vmem:[#allocation2 + $0x6c] ss:$16 sps:$4 sm:$0xff]   ;;  %v5400_v25 = vld [vmem:[#allocation2 + $0x60] ss:$16 sps:$4 sm:$0xff]   ;;  %v5401_v26 = vld [vmem:[#allocation2 + $0x44] ss:$16 sps:$4 sm:$0xff]  }
  0x5e   : > { %4676 = vmatmul.mubr.msk.bf16.vlgmr.msra.gmra.mxu0 %vm423_vm1, %v416_v9  ;;  %v5397_v27 = vld [vmem:[#allocation2 + $0x68] ss:$16 sps:$4 sm:$0xff]   ;;  %v5405_v28 = vld [vmem:[#allocation2 + $0x4c] ss:$16 sps:$4 sm:$0xff]   ;;  %v5406_v29 = vld [vmem:[#allocation2 + $0x40] ss:$16 sps:$4 sm:$0xff]  }
  0x5f   : > { %933 = vmatpush1.bf16.msra.mxu0 %v5373_v6  ;;  %v5407_v30 = vld [vmem:[#allocation2 + $0x24] ss:$16 sps:$4 sm:$0xff]   ;;  %v5403_v31 = vld [vmem:[#allocation2 + $0x48] ss:$16 sps:$4 sm:$0xff]   ;;  %v5411_v32 = vld [vmem:[#allocation2 + $0x2c] ss:$16 sps:$4 sm:$0xff]  }
  0x60   : > { %934 = vmatprep.subr.bf16.mxu0 %v5381_v12  ;;  %896 = vmatpush1.bf16.msra.mxu1 %v5388_v17  ;;  %v5412_v33 = vld [vmem:[#allocation2 + $0x20] ss:$16 sps:$4 sm:$0xff]   ;;  %v5409_v34 = vld [vmem:[#allocation2 + $0x28] ss:$16 sps:$4 sm:$0xff]   ;;  %v5413_v35 = vld [vmem:[#allocation2 + $0x4] ss:$16 sps:$4 sm:$0xff]  }
  0x61   : > { %897 = vmatprep.subr.bf16.mxu1 %v5389_v18  ;;  %v5417_v36 = vld [vmem:[#allocation2 + $0xc] ss:$16 sps:$4 sm:$0xff]   ;;  %v5418_v37 = vld [vmem:[#allocation2] ss:$16 sps:$4 sm:$0xff]   ;;  %v5419_v38 = vld [vmem:[#allocation2 + $0x1e4] ss:$16 sps:$4 sm:$0xff]  }
  0x62   : > { %v5415_v39 = vld [vmem:[#allocation2 + $0x8] ss:$16 sps:$4 sm:$0xff]   ;;  %v5423_v40 = vld [vmem:[#allocation2 + $0x1ec] ss:$16 sps:$4 sm:$0xff]   ;;  %v5424_v41 = vld [vmem:[#allocation2 + $0x1e0] ss:$16 sps:$4 sm:$0xff]  }
  0x63   : > { %935 = vmatpush1.bf16.msra.mxu0 %v5379_v15  ;;  %v5425_v42 = vld [vmem:[#allocation2 + $0x1c4] ss:$16 sps:$4 sm:$0xff]   ;;  %v5421_v43 = vld [vmem:[#allocation2 + $0x1e8] ss:$16 sps:$4 sm:$0xff]   ;;  %v5429_v44 = vld [vmem:[#allocation2 + $0x1cc] ss:$16 sps:$4 sm:$0xff]  }
  0x64   : > { %936 = vmatprep.subr.bf16.mxu0 %v5387_v16  ;;  %898 = vmatpush1.bf16.msra.mxu1 %v5394_v21  ;;  %v5430_v45 = vld [vmem:[#allocation2 + $0x1c0] ss:$16 sps:$4 sm:$0xff]   ;;  %v5427_v46 = vld [vmem:[#allocation2 + $0x1c8] ss:$16 sps:$4 sm:$0xff]   ;;  %v5431_v47 = vld [vmem:[#allocation2 + $0x1a4] ss:$16 sps:$4 sm:$0xff]  }
  0x65   : > { %899 = vmatprep.subr.bf16.mxu1 %v5395_v22  ;;  %v5435_v48 = vld [vmem:[#allocation2 + $0x1ac] ss:$16 sps:$4 sm:$0xff]   ;;  %v5433_v49 = vld [vmem:[#allocation2 + $0x1a8] ss:$16 sps:$4 sm:$0xff]   ;;  %v5436_v50 = vld [vmem:[#allocation2 + $0x1a0] ss:$16 sps:$4 sm:$0xff]  }
  0x66   : > { %v5437_v51 = vld [vmem:[#allocation2 + $0x184] ss:$16 sps:$4 sm:$0xff]   ;;  %v5441_v52 = vld [vmem:[#allocation2 + $0x18c] ss:$16 sps:$4 sm:$0xff]   ;;  %v5439_v53 = vld [vmem:[#allocation2 + $0x188] ss:$16 sps:$4 sm:$0xff]  }
  0x67   : > { %937 = vmatpush1.bf16.msra.mxu0 %v5385_v19  ;;  %v5442_v54 = vld [vmem:[#allocation2 + $0x180] ss:$16 sps:$4 sm:$0xff]   ;;  %v5443_v55 = vld [vmem:[#allocation2 + $0x164] ss:$16 sps:$4 sm:$0xff]   ;;  %v5447_v56 = vld [vmem:[#allocation2 + $0x16c] ss:$16 sps:$4 sm:$0xff]  }
  0x68   : > { %938 = vmatprep.subr.bf16.mxu0 %v5393_v20  ;;  %900 = vmatpush1.bf16.msra.mxu1 %v5400_v25  ;;  %v5445_v57 = vld [vmem:[#allocation2 + $0x168] ss:$16 sps:$4 sm:$0xff]   ;;  %v5448_v58 = vld [vmem:[#allocation2 + $0x160] ss:$16 sps:$4 sm:$0xff]   ;;  %v5449_v59 = vld [vmem:[#allocation2 + $0x144] ss:$16 sps:$4 sm:$0xff]  }
  0x69   : > { %901 = vmatprep.subr.bf16.mxu1 %v5401_v26  ;;  %v5453_v60 = vld [vmem:[#allocation2 + $0x14c] ss:$16 sps:$4 sm:$0xff]   ;;  %v5451_v61 = vld [vmem:[#allocation2 + $0x148] ss:$16 sps:$4 sm:$0xff]   ;;  %v5454_v62 = vld [vmem:[#allocation2 + $0x140] ss:$16 sps:$4 sm:$0xff]  }
  0x6a   : > { %v5455_v63 = vld [vmem:[#allocation2 + $0x124] ss:$16 sps:$4 sm:$0xff]   ;;  %v5459_v0 = vld [vmem:[#allocation2 + $0x12c] ss:$16 sps:$4 sm:$0xff]   ;;  %v5457_v1 = vld [vmem:[#allocation2 + $0x128] ss:$16 sps:$4 sm:$0xff]  }
  0x6b   : > { %939 = vmatpush1.bf16.msra.mxu0 %v5391_v23  ;;  %v5460_v2 = vld [vmem:[#allocation2 + $0x120] ss:$16 sps:$4 sm:$0xff]   ;;  %v5461_v3 = vld [vmem:[#allocation2 + $0x104] ss:$16 sps:$4 sm:$0xff]   ;;  %v5463_v4 = vld [vmem:[#allocation2 + $0x108] ss:$16 sps:$4 sm:$0xff]  }
  0x6c   : > { %940 = vmatprep.subr.bf16.mxu0 %v5399_v24  ;;  %902 = vmatpush1.bf16.msra.mxu1 %v5406_v29  ;;  %v5465_v5 = vld [vmem:[#allocation2 + $0x10c] ss:$16 sps:$4 sm:$0xff]   ;;  %v5466_v6 = vld [vmem:[#allocation2 + $0x100] ss:$16 sps:$4 sm:$0xff]   ;;  %v5469_v7 = vld [vmem:[#allocation5 + $0xe4] ss:$16 sps:$4 sm:$0xff]  }
  0x6d   : > { %903 = vmatprep.subr.bf16.mxu1 %v5407_v30  ;;  %v5472_v8 = vld [vmem:[#allocation5 + $0x2e4] ss:$16 sps:$4 sm:$0xff]   ;;  %v5467_v22 = vld [vmem:[#allocation5 + $0xe0] ss:$16 sps:$4 sm:$0xff]   ;;  %s409_s20 = scalar_lea.vmem [#allocation10], %s4671_s11  ;;  %s4546_s12 = scalar_lea.sflag [#allocation4], %s407_s29 }
  0x6e   : > { %v5470_v23 = vld [vmem:[#allocation5 + $0x2e0] ss:$16 sps:$4 sm:$0xff]   ;;  %v5475_v25 = vld [vmem:[#allocation5 + $0xc4] ss:$16 sps:$4 sm:$0xff]   ;;  %s4559_s21 = sshll.u32 %s409_s20, 4  ;;  %p6277_p1 = scmp.ne.s32.totalorder %s6267_s23, 0  ;;  %s4560_s21 = int_to_ptr.vmem [resolvable:$true] %s4559_s21 }
  0x6f   : > { %941 = vmatpush1.bf16.msra.mxu0 %v5397_v27  ;;  %v5478_v26 = vld [vmem:[#allocation5 + $0x2c4] ss:$16 sps:$4 sm:$0xff]   ;;  %v5473_v27 = vld [vmem:[#allocation5 + $0xc0] ss:$16 sps:$4 sm:$0xff]   ;;  %s5831_s25 = scalar_lea.vmem %s4560_s21, 128  ;;  %s5916_s17 = smov [#allocation10]  }
  0x70   : > { %942 = vmatprep.subr.bf16.mxu0 %v5405_v28  ;;  %904 = vmatpush1.bf16.msra.mxu1 %v5412_v33  ;;  %v5476_v28 = vld [vmem:[#allocation5 + $0x2c0] ss:$16 sps:$4 sm:$0xff]   ;;  %v5481_v29 = vld [vmem:[#allocation5 + $0xa4] ss:$16 sps:$4 sm:$0xff]   ;;  %p5832_p9 = scmp.ne.s32.totalorder %s4560_s21, %s5831_s25  ;;  %s5835_s28 = sshll.u32 %s5916_s17, 4  ;;  %s5836_s28 = int_to_ptr.vmem [resolvable:$false] %s5835_s28 }
  0x71   : > { %905 = vmatprep.subr.bf16.mxu1 %v5413_v35  ;;  %v5484_v30 = vld [vmem:[#allocation5 + $0x2a4] ss:$16 sps:$4 sm:$0xff]   ;;  %v5485_v35 = vld [vmem:[#allocation5 + $0x80] ss:$16 sps:$4 sm:$0xff]   ;;  %s5837_s26 = scalar_lea.vmem %s5836_s28, 256  ;;  %p5838_p2 = scmp.lt.s32.totalorder %s4560_s21, %s5836_s28 }
  0x72   : > { %v5487_v33 = vld [vmem:[#allocation5 + $0x84] ss:$16 sps:$4 sm:$0xff]   ;;  %p5833_p3 = pnand %p5832_p9, %p6277_p1  ;;  %p5839_p4 = scmp.lt.s32.totalorder %s5837_s26, %s5831_s25 }
  0x73   : > { %943 = vmatpush1.bf16.msra.mxu0 %v5403_v31  ;;  %v5479_v31 = vld [vmem:[#allocation5 + $0xa0] ss:$16 sps:$4 sm:$0xff]  }
  0x74   : > { %944 = vmatprep.subr.bf16.mxu0 %v5411_v32  ;;  %906 = vmatpush1.bf16.msra.mxu1 %v5418_v37  ;;  %v5482_v32 = vld [vmem:[#allocation5 + $0x2a0] ss:$16 sps:$4 sm:$0xff]   ;;  %v5493_v37 = vld [vmem:[#allocation5 + $0x64] ss:$16 sps:$4 sm:$0xff]   ;;  %p5834_p5 = pneg %p5833_p3  ;;  %p5840_p7 = por %p5839_p4, %p5838_p2 }
  0x75   : > { %907 = vmatprep.subr.bf16.mxu1 %v5419_v38  ;;  %v5496_v38 = vld [vmem:[#allocation5 + $0x264] ss:$16 sps:$4 sm:$0xff]  }
  0x76   : > { %p5841_p8 = pnand %p5840_p7, %p5834_p5 }
  0x77   : > { %945 = vmatpush1.bf16.msra.mxu0 %v5409_v34  ;;  %v5490_v34 = vld [vmem:[#allocation5 + $0x284] ss:$16 sps:$4 sm:$0xff]  }
  0x78   : > { %946 = vmatprep.subr.bf16.mxu0 %v5417_v36  ;;  %908 = vmatpush2.bf16.msra.mxu1 %v5424_v41  ;;  %v5488_v36 = vld [vmem:[#allocation5 + $0x280] ss:$16 sps:$4 sm:$0xff]   ;;  %v5499_v41 = vld [vmem:[#allocation5 + $0x44] ss:$16 sps:$4 sm:$0xff]  }
  0x79   : > { %909 = vmatprep.subr.bf16.mxu1 %v5425_v42  ;;  %v5502_v42 = vld [vmem:[#allocation5 + $0x244] ss:$16 sps:$4 sm:$0xff]  }
  0x7b   : > { %947 = vmatpush1.bf16.msra.mxu0 %v5415_v39  ;;  %v5491_v39 = vld [vmem:[#allocation5 + $0x60] ss:$16 sps:$4 sm:$0xff]  }
  0x7c   : > { %948 = vmatprep.subr.bf16.mxu0 %v5423_v40  ;;  %910 = vmatpush2.bf16.msra.mxu1 %v5430_v45  ;;  %v5494_v40 = vld [vmem:[#allocation5 + $0x260] ss:$16 sps:$4 sm:$0xff]   ;;  %v5505_v45 = vld [vmem:[#allocation5 + $0x24] ss:$16 sps:$4 sm:$0xff]  }
  0x7d   : > { %911 = vmatprep.subr.bf16.mxu1 %v5431_v47  ;;  %v5503_v47 = vld [vmem:[#allocation5 + $0x20] ss:$16 sps:$4 sm:$0xff]  }
  0x7f   : > { %949 = vmatpush2.bf16.msra.mxu0 %v5421_v43  ;;  %v5497_v43 = vld [vmem:[#allocation5 + $0x40] ss:$16 sps:$4 sm:$0xff]  }
  0x80   : > { %950 = vmatprep.subr.bf16.mxu0 %v5429_v44  ;;  %912 = vmatpush2.bf16.msra.mxu1 %v5436_v50  ;;  %v5500_v44 = vld [vmem:[#allocation5 + $0x240] ss:$16 sps:$4 sm:$0xff]   ;;  %v5514_v50 = vld [vmem:[#allocation5 + $0x204] ss:$16 sps:$4 sm:$0xff]  }
  0x81   : > { %913 = vmatprep.subr.bf16.mxu1 %v5437_v51  ;;  %v5509_v51 = vld [vmem:[#allocation5] ss:$16 sps:$4 sm:$0xff]  }
  0x83   : > { %951 = vmatpush2.bf16.msra.mxu0 %v5427_v46  ;;  %v5508_v46 = vld [vmem:[#allocation5 + $0x224] ss:$16 sps:$4 sm:$0xff]  }
  0x84   : > { %952 = vmatprep.subr.bf16.mxu0 %v5435_v48  ;;  %914 = vmatpush2.bf16.msra.mxu1 %v5442_v54  ;;  %v5506_v48 = vld [vmem:[#allocation5 + $0x220] ss:$16 sps:$4 sm:$0xff]   ;;  %v5520_v54 = vld [vmem:[#allocation5 + $0x3e4] ss:$16 sps:$4 sm:$0xff]  }
  0x85   : > { %915 = vmatprep.subr.bf16.mxu1 %v5443_v55  ;;  %v5515_v55 = vld [vmem:[#allocation5 + $0x1e0] ss:$16 sps:$4 sm:$0xff]  }
  0x87   : > { %953 = vmatpush2.bf16.msra.mxu0 %v5433_v49  ;;  %v5511_v49 = vld [vmem:[#allocation5 + $0x4] ss:$16 sps:$4 sm:$0xff]  }
  0x88   : > { %954 = vmatprep.subr.bf16.mxu0 %v5441_v52  ;;  %916 = vmatpush2.bf16.msra.mxu1 %v5448_v58  ;;  %v5512_v52 = vld [vmem:[#allocation5 + $0x200] ss:$16 sps:$4 sm:$0xff]   ;;  %v5526_v58 = vld [vmem:[#allocation5 + $0x3c4] ss:$16 sps:$4 sm:$0xff]  }
  0x89   : > { %917 = vmatprep.subr.bf16.mxu1 %v5449_v59  ;;  %v5521_v59 = vld [vmem:[#allocation5 + $0x1c0] ss:$16 sps:$4 sm:$0xff]  }
  0x8b   : > { %955 = vmatpush2.bf16.msra.mxu0 %v5439_v53  ;;  %v5517_v53 = vld [vmem:[#allocation5 + $0x1e4] ss:$16 sps:$4 sm:$0xff]  }
  0x8c   : > { %956 = vmatprep.subr.bf16.mxu0 %v5447_v56  ;;  %918 = vmatpush2.bf16.msra.mxu1 %v5454_v62  ;;  %v5518_v56 = vld [vmem:[#allocation5 + $0x3e0] ss:$16 sps:$4 sm:$0xff]   ;;  %v5532_v62 = vld [vmem:[#allocation5 + $0x3a4] ss:$16 sps:$4 sm:$0xff]  }
  0x8d   : > { %919 = vmatprep.subr.bf16.mxu1 %v5455_v63  ;;  %v5527_v63 = vld [vmem:[#allocation5 + $0x1a0] ss:$16 sps:$4 sm:$0xff]  }
  0x8f   : > { %957 = vmatpush2.bf16.msra.mxu0 %v5445_v57  ;;  %v5523_v57 = vld [vmem:[#allocation5 + $0x1c4] ss:$16 sps:$4 sm:$0xff]  }
  0x90   : > { %958 = vmatprep.subr.bf16.mxu0 %v5453_v60  ;;  %920 = vmatpush2.bf16.msra.mxu1 %v5460_v2  ;;  %v5524_v60 = vld [vmem:[#allocation5 + $0x3c0] ss:$16 sps:$4 sm:$0xff]   ;;  %v5538_v2 = vld [vmem:[#allocation5 + $0x384] ss:$16 sps:$4 sm:$0xff]  }
  0x91   : > { %921 = vmatprep.subr.bf16.mxu1 %v5461_v3  ;;  %v5533_v3 = vld [vmem:[#allocation5 + $0x180] ss:$16 sps:$4 sm:$0xff]  }
  0x93   : > { %959 = vmatpush2.bf16.msra.mxu0 %v5451_v61  ;;  %v5529_v61 = vld [vmem:[#allocation5 + $0x1a4] ss:$16 sps:$4 sm:$0xff]  }
  0x94   : > { %960 = vmatprep.subr.bf16.mxu0 %v5459_v0  ;;  %922 = vmatpush2.bf16.msra.mxu1 %v5466_v6  ;;  %v5530_v0 = vld [vmem:[#allocation5 + $0x3a0] ss:$16 sps:$4 sm:$0xff]   ;;  %v5544_v6 = vld [vmem:[#allocation5 + $0x364] ss:$16 sps:$4 sm:$0xff]  }
  0x95   : > { %1771 = vmatprep.subr.bf16.mxu1 %v5469_v7  ;;  %v5539_v7 = vld [vmem:[#allocation5 + $0x160] ss:$16 sps:$4 sm:$0xff]  }
  0x97   : > { %961 = vmatpush2.bf16.msra.mxu0 %v5457_v1  ;;  %v5535_v1 = vld [vmem:[#allocation5 + $0x184] ss:$16 sps:$4 sm:$0xff]  }
  0x98   : > { %962 = vmatprep.subr.bf16.mxu0 %v5465_v5  ;;  %v5541_v5 = vld [vmem:[#allocation5 + $0x164] ss:$16 sps:$4 sm:$0xff]  }
  0x9b   : > { %963 = vmatpush2.bf16.msra.mxu0 %v5463_v4  ;;  %v5536_v4 = vld [vmem:[#allocation5 + $0x380] ss:$16 sps:$4 sm:$0xff]  }
  0x9c   : > { %1812 = vmatprep.subr.bf16.mxu0 %v5472_v8  ;;  %v5542_v8 = vld [vmem:[#allocation5 + $0x360] ss:$16 sps:$4 sm:$0xff]  }
 0x11e   : > { %v468_v9 = vpop.f32.mrf.mxu0 }
 0x11f   : > { %v475_v10 = vmul.f32 0.5, %v468_v9  ;;  %v5547_v9 = vld [vmem:[#allocation5 + $0x144] ss:$16 sps:$4 sm:$0xff]  }
 0x120   : > { %v470_v11 = vpop.f32.mrf.mxu0 }
 0x121   : > { %5723 = vtanh.f32 %v475_v10  ;;  %v476_v12 = vmul.f32 0.5, %v470_v11  ;;  %v5550_v10 = vld [vmem:[#allocation5 + $0x344] ss:$16 sps:$4 sm:$0xff]   ;;  %v5545_v11 = vld [vmem:[#allocation5 + $0x140] ss:$16 sps:$4 sm:$0xff]  }
 0x122   : > { %v472_v13 = vpop.f32.mrf.mxu0 }
 0x123   : > { %5725 = vtanh.f32 %v476_v12  ;;  %v5548_v12 = vld [vmem:[#allocation5 + $0x340] ss:$16 sps:$4 sm:$0xff]   ;;  %v5553_v13 = vld [vmem:[#allocation5 + $0x124] ss:$16 sps:$4 sm:$0xff]  }
 0x124   : > { %v473_v14 = vpop.f32.mrf.mxu0 }
 0x125   : > { %v5556_v14 = vld [vmem:[#allocation5 + $0x324] ss:$16 sps:$4 sm:$0xff]  }
 0x12e   : > { %v5724_v15 = vpop.eup %5723 }
 0x12f   : > { %v479_v16 = vadd.f32 1.0, %v5724_v15  ;;  %v5551_v15 = vld [vmem:[#allocation5 + $0x120] ss:$16 sps:$4 sm:$0xff]  }
 0x130   : > { %v5726_v17 = vpop.eup %5725 }
 0x131   : > { %v480_v18 = vadd.f32 1.0, %v5726_v17  ;;  %v481_v19 = vmul.f32 0.5, %v479_v16  ;;  %v5554_v16 = vld [vmem:[#allocation5 + $0x320] ss:$16 sps:$4 sm:$0xff]   ;;  %v5559_v17 = vld [vmem:[#allocation5 + $0x104] ss:$16 sps:$4 sm:$0xff]  }
 0x133   : > { %v482_v20 = vmul.f32 0.5, %v480_v18  ;;  %v483_v24 = vpack.c.bf16 %v481_v19, %v481_v19  ;;  %v5562_v18 = vld [vmem:[#allocation5 + $0x304] ss:$16 sps:$4 sm:$0xff]   ;;  %v5557_v19 = vld [vmem:[#allocation5 + $0x100] ss:$16 sps:$4 sm:$0xff]  }
 0x135   : > { %v484_v21 = vpack.c.bf16 %v482_v20, %v482_v20  ;;  %v5560_v20 = vld [vmem:[#allocation5 + $0x300] ss:$16 sps:$4 sm:$0xff]  }
 0x137   : > { %923 = vmatprep.mubr.bf16.mxu1 %v484_v21  ;;  %964 = vmatprep.mubr.bf16.mxu0 %v484_v21  ;;  %v5565_v21 = vld [vmem:[#allocation5 + $0xec] ss:$16 sps:$4 sm:$0xff]  }
 0x138   : > { %924 = vmatmul.mubr.bf16.vlgmr.msra.gmra.mxu1 %v483_v24  ;;  %965 = vmatmul.mubr.bf16.vlgmr.msra.gmra.mxu0 %v483_v24 }
 0x139   : > { %1772 = vmatpush1.bf16.msra.mxu1 %v5467_v22  ;;  %1813 = vmatpush1.bf16.msra.mxu0 %v5470_v23  ;;  %v5568_v22 = vld [vmem:[#allocation5 + $0x2ec] ss:$16 sps:$4 sm:$0xff]   ;;  %v551_v23 = vlaneseq }
 0x13a   : > { %1773 = vmatprep.subr.bf16.mxu1 %v5475_v25  ;;  %1814 = vmatprep.subr.bf16.mxu0 %v5478_v26 }
 0x13b   : > { %v6089_v24 = vshrl.u32 %v551_v23, 7  ;;  %v5614_v23 = vld [vmem:[#allocation5 + $0x3e8] ss:$16 sps:$4 sm:$0xff]  }
 0x13d   : > { %1774 = vmatpush1.bf16.msra.mxu1 %v5473_v27  ;;  %1815 = vmatpush1.bf16.msra.mxu0 %v5476_v28  ;;  %v6092_v25 = vsub.s32 0, %v6089_v24  ;;  %v6095_v26 = vsub.s32 2, %v6089_v24  ;;  %v549_v27 = vld [vmem:[%s6256_s3] sm:$0xf]  ;;  %v6101_v28 = vsub.s32 1, %v6089_v24 }
 0x13e   : > { %1775 = vmatprep.subr.bf16.mxu1 %v5481_v29  ;;  %1816 = vmatprep.subr.bf16.mxu0 %v5484_v30  ;;  %v6104_v29 = vsub.s32 3, %v6089_v24 }
 0x13f   : > { %v554_v30 = vrot.slane %v549_v27, %v6092_v25 }
 0x141   : > { %1776 = vmatpush1.bf16.msra.mxu1 %v5479_v31  ;;  %1817 = vmatpush1.bf16.msra.mxu0 %v5482_v32  ;;  %v562_v31 = vrot.slane %v549_v27, %v6095_v26  ;;  %v558_v32 = vrot.slane %v549_v27, %v6101_v28 }
 0x142   : > { %1777 = vmatprep.subr.bf16.mxu1 %v5487_v33  ;;  %1818 = vmatprep.subr.bf16.mxu0 %v5490_v34  ;;  %v566_v33 = vrot.slane %v549_v27, %v6104_v29  ;;  %v5619_v27 = vld [vmem:[#allocation5 + $0x1cc] ss:$16 sps:$4 sm:$0xff]  }
 0x145   : > { %1778 = vmatpush1.bf16.msra.mxu1 %v5485_v35  ;;  %1819 = vmatpush1.bf16.msra.mxu0 %v5488_v36 }
 0x146   : > { %1779 = vmatprep.subr.bf16.mxu1 %v5493_v37  ;;  %1820 = vmatprep.subr.bf16.mxu0 %v5496_v38 }
 0x149   : > { %1780 = vmatpush1.bf16.msra.mxu1 %v5491_v39  ;;  %1821 = vmatpush1.bf16.msra.mxu0 %v5494_v40 }
 0x14a   : > { %1781 = vmatprep.subr.bf16.mxu1 %v5499_v41  ;;  %1822 = vmatprep.subr.bf16.mxu0 %v5502_v42 }
 0x14d   : > { %1782 = vmatpush1.bf16.msra.mxu1 %v5497_v43  ;;  %1823 = vmatpush1.bf16.msra.mxu0 %v5500_v44 }
 0x14e   : > { %1783 = vmatprep.subr.bf16.mxu1 %v5505_v45  ;;  %1824 = vmatprep.subr.bf16.mxu0 %v5508_v46 }
 0x151   : > { %1784 = vmatpush1.bf16.msra.mxu1 %v5503_v47  ;;  %1825 = vmatpush1.bf16.msra.mxu0 %v5506_v48 }
 0x152   : > { %1785 = vmatprep.subr.bf16.mxu1 %v5511_v49  ;;  %1826 = vmatprep.subr.bf16.mxu0 %v5514_v50 }
 0x155   : > { %1786 = vmatpush1.bf16.msra.mxu1 %v5509_v51  ;;  %1827 = vmatpush1.bf16.msra.mxu0 %v5512_v52  ;;  %v5563_v52 = vld [vmem:[#allocation5 + $0xe8] ss:$16 sps:$4 sm:$0xff]  }
 0x156   : > { %1787 = vmatprep.subr.bf16.mxu1 %v5517_v53  ;;  %1828 = vmatprep.subr.bf16.mxu0 %v5520_v54  ;;  %v5566_v53 = vld [vmem:[#allocation5 + $0x2e8] ss:$16 sps:$4 sm:$0xff]  }
 0x159   : > { %1788 = vmatpush2.bf16.msra.mxu1 %v5515_v55  ;;  %1829 = vmatpush2.bf16.msra.mxu0 %v5518_v56  ;;  %v5571_v56 = vld [vmem:[#allocation5 + $0xcc] ss:$16 sps:$4 sm:$0xff]  }
 0x15a   : > { %1789 = vmatprep.subr.bf16.mxu1 %v5523_v57  ;;  %1830 = vmatprep.subr.bf16.mxu0 %v5526_v58  ;;  %v5574_v57 = vld [vmem:[#allocation5 + $0x2cc] ss:$16 sps:$4 sm:$0xff]   ;;  %v5569_v58 = vld [vmem:[#allocation5 + $0xc8] ss:$16 sps:$4 sm:$0xff]  }
 0x15d   : > { %1790 = vmatpush2.bf16.msra.mxu1 %v5521_v59  ;;  %1831 = vmatpush2.bf16.msra.mxu0 %v5524_v60  ;;  %v5572_v59 = vld [vmem:[#allocation5 + $0x2c8] ss:$16 sps:$4 sm:$0xff]   ;;  %v5577_v60 = vld [vmem:[#allocation5 + $0xac] ss:$16 sps:$4 sm:$0xff]  }
 0x15e   : > { %1791 = vmatprep.subr.bf16.mxu1 %v5529_v61  ;;  %1832 = vmatprep.subr.bf16.mxu0 %v5532_v62  ;;  %v5580_v61 = vld [vmem:[#allocation5 + $0x2ac] ss:$16 sps:$4 sm:$0xff]   ;;  %v5575_v62 = vld [vmem:[#allocation5 + $0xa8] ss:$16 sps:$4 sm:$0xff]  }
 0x161   : > { %1792 = vmatpush2.bf16.msra.mxu1 %v5527_v63  ;;  %1833 = vmatpush2.bf16.msra.mxu0 %v5530_v0  ;;  %v5578_v63 = vld [vmem:[#allocation5 + $0x2a8] ss:$16 sps:$4 sm:$0xff]   ;;  %v5583_v0 = vld [vmem:[#allocation5 + $0x8c] ss:$16 sps:$4 sm:$0xff]  }
 0x162   : > { %1793 = vmatprep.subr.bf16.mxu1 %v5535_v1  ;;  %1834 = vmatprep.subr.bf16.mxu0 %v5538_v2  ;;  %v5586_v1 = vld [vmem:[#allocation5 + $0x28c] ss:$16 sps:$4 sm:$0xff]   ;;  %v5581_v2 = vld [vmem:[#allocation5 + $0x88] ss:$16 sps:$4 sm:$0xff]  }
 0x165   : > { %1794 = vmatpush2.bf16.msra.mxu1 %v5533_v3  ;;  %1835 = vmatpush2.bf16.msra.mxu0 %v5536_v4  ;;  %v5584_v3 = vld [vmem:[#allocation5 + $0x288] ss:$16 sps:$4 sm:$0xff]   ;;  %v5589_v4 = vld [vmem:[#allocation5 + $0x6c] ss:$16 sps:$4 sm:$0xff]  }
 0x166   : > { %1795 = vmatprep.subr.bf16.mxu1 %v5541_v5  ;;  %1836 = vmatprep.subr.bf16.mxu0 %v5544_v6  ;;  %v5592_v5 = vld [vmem:[#allocation5 + $0x26c] ss:$16 sps:$4 sm:$0xff]   ;;  %v5587_v6 = vld [vmem:[#allocation5 + $0x68] ss:$16 sps:$4 sm:$0xff]  }
 0x169   : > { %1796 = vmatpush2.bf16.msra.mxu1 %v5539_v7  ;;  %1837 = vmatpush2.bf16.msra.mxu0 %v5542_v8  ;;  %v5590_v7 = vld [vmem:[#allocation5 + $0x268] ss:$16 sps:$4 sm:$0xff]   ;;  %v5595_v8 = vld [vmem:[#allocation5 + $0x4c] ss:$16 sps:$4 sm:$0xff]  }
 0x16a   : > { %1797 = vmatprep.subr.bf16.mxu1 %v5547_v9  ;;  %1838 = vmatprep.subr.bf16.mxu0 %v5550_v10  ;;  %v5598_v9 = vld [vmem:[#allocation5 + $0x24c] ss:$16 sps:$4 sm:$0xff]   ;;  %v5593_v10 = vld [vmem:[#allocation5 + $0x48] ss:$16 sps:$4 sm:$0xff]  }
 0x16d   : > { %1798 = vmatpush2.bf16.msra.mxu1 %v5545_v11  ;;  %1839 = vmatpush2.bf16.msra.mxu0 %v5548_v12  ;;  %v5596_v11 = vld [vmem:[#allocation5 + $0x248] ss:$16 sps:$4 sm:$0xff]   ;;  %v5601_v12 = vld [vmem:[#allocation5 + $0x2c] ss:$16 sps:$4 sm:$0xff]  }
 0x16e   : > { %1799 = vmatprep.subr.bf16.mxu1 %v5553_v13  ;;  %1840 = vmatprep.subr.bf16.mxu0 %v5556_v14  ;;  %v5604_v13 = vld [vmem:[#allocation5 + $0x22c] ss:$16 sps:$4 sm:$0xff]   ;;  %v5599_v14 = vld [vmem:[#allocation5 + $0x28] ss:$16 sps:$4 sm:$0xff]  }
 0x171   : > { %1800 = vmatpush2.bf16.msra.mxu1 %v5551_v15  ;;  %1841 = vmatpush2.bf16.msra.mxu0 %v5554_v16  ;;  %v5602_v15 = vld [vmem:[#allocation5 + $0x228] ss:$16 sps:$4 sm:$0xff]   ;;  %v5607_v16 = vld [vmem:[#allocation5 + $0xc] ss:$16 sps:$4 sm:$0xff]  }
 0x172   : > { %1801 = vmatprep.subr.bf16.mxu1 %v5559_v17  ;;  %1842 = vmatprep.subr.bf16.mxu0 %v5562_v18  ;;  %v5610_v17 = vld [vmem:[#allocation5 + $0x20c] ss:$16 sps:$4 sm:$0xff]   ;;  %v5605_v18 = vld [vmem:[#allocation5 + $0x8] ss:$16 sps:$4 sm:$0xff]  }
 0x175   : > { %1802 = vmatpush2.bf16.msra.mxu1 %v5557_v19  ;;  %1843 = vmatpush2.bf16.msra.mxu0 %v5560_v20  ;;  %v5608_v19 = vld [vmem:[#allocation5 + $0x208] ss:$16 sps:$4 sm:$0xff]   ;;  %v5613_v20 = vld [vmem:[#allocation5 + $0x1ec] ss:$16 sps:$4 sm:$0xff]  }
 0x176   : > { %1853 = vmatprep.subr.bf16.mxu1 %v5565_v21  ;;  %1894 = vmatprep.subr.bf16.mxu0 %v5568_v22  ;;  %v5616_v21 = vld [vmem:[#allocation5 + $0x3ec] ss:$16 sps:$4 sm:$0xff]   ;;  %v5611_v22 = vld [vmem:[#allocation5 + $0x1e8] ss:$16 sps:$4 sm:$0xff]  }
 0x1f8   : > { %v925_v34 = vpop.f32.mrf.mxu1  ;;  %v966_v35 = vpop.f32.mrf.mxu0 }
 0x1f9   : > { %v926_v36 = vadd.f32 %v925_v34, %v554_v30  ;;  %v967_v37 = vadd.f32 %v966_v35, %v562_v31  ;;  %v5622_v30 = vld [vmem:[#allocation5 + $0x3cc] ss:$16 sps:$4 sm:$0xff]   ;;  %v5617_v31 = vld [vmem:[#allocation5 + $0x1c8] ss:$16 sps:$4 sm:$0xff]  }
 0x1fa   : > { %v927_v38 = vpop.f32.mrf.mxu1  ;;  %v968_v39 = vpop.f32.mrf.mxu0  ;;  %v5628_v34 = vld [vmem:[#allocation5 + $0x3ac] ss:$16 sps:$4 sm:$0xff]   ;;  %v5623_v35 = vld [vmem:[#allocation5 + $0x1a8] ss:$16 sps:$4 sm:$0xff]  }
 0x1fb   : > { %v928_v40 = vadd.f32 %v927_v38, %v558_v32  ;;  %v969_v41 = vadd.f32 %v968_v39, %v566_v33  ;;  %v973_v42 = vmax.f32 %v926_v36, 0.0  ;;  %v975_v43 = vmax.f32 %v967_v37, 0.0  ;;  %v5620_v32 = vld [vmem:[#allocation5 + $0x3c8] ss:$16 sps:$4 sm:$0xff]   ;;  %v5625_v33 = vld [vmem:[#allocation5 + $0x1ac] ss:$16 sps:$4 sm:$0xff]  }
 0x1fc   : > { %v929_v44 = vpop.f32.mrf.mxu1  ;;  %v970_v45 = vpop.f32.mrf.mxu0  ;;  %v5626_v36 = vld [vmem:[#allocation5 + $0x3a8] ss:$16 sps:$4 sm:$0xff]   ;;  %v5631_v37 = vld [vmem:[#allocation5 + $0x18c] ss:$16 sps:$4 sm:$0xff]  }
 0x1fd   : > { %v974_v46 = vmax.f32 %v928_v40, 0.0  ;;  %v976_v47 = vmax.f32 %v969_v41, 0.0  ;;  %v6110_v54 = vpack.c.bf16 %v973_v42, %v973_v42  ;;  %v6112_v55 = vpack.c.bf16 %v975_v43, %v975_v43  ;;  %v5634_v38 = vld [vmem:[#allocation5 + $0x38c] ss:$16 sps:$4 sm:$0xff]   ;;  %v5629_v39 = vld [vmem:[#allocation5 + $0x188] ss:$16 sps:$4 sm:$0xff]  }
 0x1fe   : > { %v930_v48 = vpop.f32.mrf.mxu1  ;;  %v971_v49 = vpop.f32.mrf.mxu0  ;;  %v5632_v40 = vld [vmem:[#allocation5 + $0x388] ss:$16 sps:$4 sm:$0xff]   ;;  %v5637_v41 = vld [vmem:[#allocation5 + $0x16c] ss:$16 sps:$4 sm:$0xff]  }
 0x1ff   : > { %v978_v50 = vpack.c.bf16 %v974_v46, %v974_v46  ;;  %v980_v51 = vpack.c.bf16 %v976_v47, %v976_v47  ;;  %v5640_v42 = vld [vmem:[#allocation5 + $0x36c] ss:$16 sps:$4 sm:$0xff]   ;;  %v5635_v43 = vld [vmem:[#allocation5 + $0x168] ss:$16 sps:$4 sm:$0xff]  }
 0x200   : > { %v5638_v44 = vld [vmem:[#allocation5 + $0x368] ss:$16 sps:$4 sm:$0xff]   ;;  %v5643_v45 = vld [vmem:[#allocation5 + $0x14c] ss:$16 sps:$4 sm:$0xff]  }
 0x201   : > { %1803 = vmatprep.mubr.bf16.mxu1 %v978_v50  ;;  %1844 = vmatprep.mubr.bf16.mxu0 %v980_v51  ;;  %v5646_v46 = vld [vmem:[#allocation5 + $0x34c] ss:$16 sps:$4 sm:$0xff]   ;;  %v5641_v47 = vld [vmem:[#allocation5 + $0x148] ss:$16 sps:$4 sm:$0xff]  }
 0x202   : > { %1804 = vmatmul.mubr.bf16.vlgmr.msra.gmra.mxu1 %v6110_v54  ;;  %1845 = vmatmul.mubr.bf16.vlgmr.msra.gmra.mxu0 %v6112_v55  ;;  %v5644_v48 = vld [vmem:[#allocation5 + $0x348] ss:$16 sps:$4 sm:$0xff]   ;;  %v5649_v49 = vld [vmem:[#allocation5 + $0x12c] ss:$16 sps:$4 sm:$0xff]  }
 0x203   : > { %1854 = vmatpush1.bf16.msra.mxu1 %v5563_v52  ;;  %1895 = vmatpush1.bf16.msra.mxu0 %v5566_v53  ;;  %v5650_v52 = vld [vmem:[#allocation5 + $0x328] ss:$16 sps:$4 sm:$0xff]   ;;  %v5655_v53 = vld [vmem:[#allocation5 + $0x10c] ss:$16 sps:$4 sm:$0xff]  }
 0x204   : > { %1885 = vmatprep.mubr.bf16.mxu1 %v978_v50  ;;  %1926 = vmatprep.mubr.bf16.mxu0 %v980_v51  ;;  %v5652_v50 = vld [vmem:[#allocation5 + $0x32c] ss:$16 sps:$4 sm:$0xff]   ;;  %v5647_v51 = vld [vmem:[#allocation5 + $0x128] ss:$16 sps:$4 sm:$0xff]  }
 0x205   : > { %1855 = vmatprep.subr.bf16.mxu1 %v5571_v56  ;;  %1896 = vmatprep.subr.bf16.mxu0 %v5574_v57  ;;  %v5658_v56 = vld [vmem:[#allocation5 + $0x30c] ss:$16 sps:$4 sm:$0xff]   ;;  %v1999_v57 = vld [vmem:[#allocation7 + $0x1c0] sm:$0xff] }
 0x207   : > { %1856 = vmatpush1.bf16.msra.mxu1 %v5569_v58  ;;  %1897 = vmatpush1.bf16.msra.mxu0 %v5572_v59  ;;  %v2003_v58 = vld [vmem:[#allocation7 + $0x1e0] sm:$0xff]  ;;  %v5653_v59 = vld [vmem:[#allocation5 + $0x108] ss:$16 sps:$4 sm:$0xff]  }
 0x208   : > { %1857 = vmatprep.subr.bf16.mxu1 %v5577_v60  ;;  %1898 = vmatprep.subr.bf16.mxu0 %v5580_v61  ;;  %v5656_v60 = vld [vmem:[#allocation5 + $0x308] ss:$16 sps:$4 sm:$0xff]   ;;  %v4926_v61 = vcombine.high %v1999_v57, %v2003_v58 }
 0x20b   : > { %1858 = vmatpush1.bf16.msra.mxu1 %v5575_v62  ;;  %1899 = vmatpush1.bf16.msra.mxu0 %v5578_v63  ;;  %v1991_v62 = vld [vmem:[#allocation7 + $0x180] sm:$0xff] }
 0x20c   : > { %1859 = vmatprep.subr.bf16.mxu1 %v5583_v0  ;;  %1900 = vmatprep.subr.bf16.mxu0 %v5586_v1  ;;  %v1995_v63 = vld [vmem:[#allocation7 + $0x1a0] sm:$0xff]  ;;  %v4925_v0 = vcombine.low %v1999_v57, %v2003_v58 }
 0x20d   : > { %v4918_v1 = vcombine.high %v1991_v62, %v1995_v63  ;;  %v2055_v58 = vld [vmem:[#allocation7 + $0x380] sm:$0xff] }
 0x20f   : > { %1860 = vmatpush1.bf16.msra.mxu1 %v5581_v2  ;;  %1901 = vmatpush1.bf16.msra.mxu0 %v5584_v3  ;;  %v1983_v2 = vld [vmem:[#allocation7 + $0x140] sm:$0xff] }
 0x210   : > { %1861 = vmatprep.subr.bf16.mxu1 %v5589_v4  ;;  %1902 = vmatprep.subr.bf16.mxu0 %v5592_v5  ;;  %v1987_v3 = vld [vmem:[#allocation7 + $0x160] sm:$0xff]  ;;  %v4917_v4 = vcombine.low %v1991_v62, %v1995_v63 }
 0x211   : > { %v4910_v5 = vcombine.high %v1983_v2, %v1987_v3 }
 0x213   : > { %1862 = vmatpush1.bf16.msra.mxu1 %v5587_v6  ;;  %1903 = vmatpush1.bf16.msra.mxu0 %v5590_v7  ;;  %v1975_v6 = vld [vmem:[#allocation7 + $0x100] sm:$0xff] }
 0x214   : > { %1863 = vmatprep.subr.bf16.mxu1 %v5595_v8  ;;  %1904 = vmatprep.subr.bf16.mxu0 %v5598_v9  ;;  %v1979_v7 = vld [vmem:[#allocation7 + $0x120] sm:$0xff]  ;;  %v4909_v8 = vcombine.low %v1983_v2, %v1987_v3 }
 0x215   : > { %v4902_v9 = vcombine.high %v1975_v6, %v1979_v7  ;;  %v2047_v2 = vld [vmem:[#allocation7 + $0x340] sm:$0xff] }
 0x216   : > { %v2051_v3 = vld [vmem:[#allocation7 + $0x360] sm:$0xff] }
 0x217   : > { %1864 = vmatpush1.bf16.msra.mxu1 %v5593_v10  ;;  %1905 = vmatpush1.bf16.msra.mxu0 %v5596_v11  ;;  %v1967_v10 = vld [vmem:[#allocation7 + $0xc0] sm:$0xff] }
 0x218   : > { %1865 = vmatprep.subr.bf16.mxu1 %v5601_v12  ;;  %1906 = vmatprep.subr.bf16.mxu0 %v5604_v13  ;;  %v1971_v11 = vld [vmem:[#allocation7 + $0xe0] sm:$0xff] }
 0x219   : > { %v2127_v12 = vld [vmem:[#allocation7 + $0x5c0] sm:$0xff] }
 0x21a   : > { %v2131_v13 = vld [vmem:[#allocation7 + $0x5e0] sm:$0xff] }
 0x21b   : > { %1866 = vmatpush1.bf16.msra.mxu1 %v5599_v14  ;;  %1907 = vmatpush1.bf16.msra.mxu0 %v5602_v15  ;;  %v4901_v14 = vcombine.low %v1975_v6, %v1979_v7  ;;  %v5053_v15 = vcombine.low %v2127_v12, %v2131_v13 }
 0x21c   : > { %1867 = vmatprep.subr.bf16.mxu1 %v5607_v16  ;;  %1908 = vmatprep.subr.bf16.mxu0 %v5610_v17  ;;  %v6118_v16 = vld [vmem:[#allocation7 + $0x1c8] sm:$0xff]  ;;  %v4894_v17 = vcombine.high %v1967_v10, %v1971_v11 }
 0x21f   : > { %1868 = vmatpush1.bf16.msra.mxu1 %v5605_v18  ;;  %1909 = vmatpush1.bf16.msra.mxu0 %v5608_v19  ;;  %v1959_v18 = vld [vmem:[#allocation7 + $0x80] sm:$0xff] }
 0x220   : > { %1869 = vmatprep.subr.bf16.mxu1 %v5613_v20  ;;  %1910 = vmatprep.subr.bf16.mxu0 %v5616_v21  ;;  %v1963_v19 = vld [vmem:[#allocation7 + $0xa0] sm:$0xff] }
 0x221   : > { %v2119_v21 = vld [vmem:[#allocation7 + $0x580] sm:$0xff] }
 0x223   : > { %1870 = vmatpush2.bf16.msra.mxu1 %v5611_v22  ;;  %1911 = vmatpush2.bf16.msra.mxu0 %v5614_v23  ;;  %v2123_v22 = vld [vmem:[#allocation7 + $0x5a0] sm:$0xff]  ;;  %v4893_v23 = vcombine.low %v1967_v10, %v1971_v11 }
 0x224   : > { %1871 = vmatprep.subr.bf16.mxu1 %v5619_v27  ;;  %1912 = vmatprep.subr.bf16.mxu0 %v5622_v30  ;;  %v5045_v27 = vcombine.low %v2119_v21, %v2123_v22  ;;  %v5046_v30 = vcombine.high %v2119_v21, %v2123_v22  ;;  %v2039_v10 = vld [vmem:[#allocation7 + $0x300] sm:$0xff] }
 0x225   : > { %v2043_v11 = vld [vmem:[#allocation7 + $0x320] sm:$0xff] }
 0x226   : > { %v2191_v21 = vld [vmem:[#allocation7 + $0x7c0] sm:$0xff] }
 0x227   : > { %1872 = vmatpush2.bf16.msra.mxu1 %v5617_v31  ;;  %1913 = vmatpush2.bf16.msra.mxu0 %v5620_v32  ;;  %v4886_v31 = vcombine.high %v1959_v18, %v1963_v19  ;;  %v1951_v32 = vld [vmem:[#allocation7 + $0x40] sm:$0xff] }
 0x228   : > { %1873 = vmatprep.subr.bf16.mxu1 %v5625_v33  ;;  %1914 = vmatprep.subr.bf16.mxu0 %v5628_v34  ;;  %v1955_v33 = vld [vmem:[#allocation7 + $0x60] sm:$0xff] }
 0x229   : > { %v2111_v34 = vld [vmem:[#allocation7 + $0x540] sm:$0xff] }
 0x22a   : > { %v2195_v22 = vld [vmem:[#allocation7 + $0x7e0] sm:$0xff] }
 0x22b   : > { %1874 = vmatpush2.bf16.msra.mxu1 %v5623_v35  ;;  %1915 = vmatpush2.bf16.msra.mxu0 %v5626_v36  ;;  %v2115_v35 = vld [vmem:[#allocation7 + $0x560] sm:$0xff]  ;;  %v4885_v36 = vcombine.low %v1959_v18, %v1963_v19 }
 0x22c   : > { %1875 = vmatprep.subr.bf16.mxu1 %v5631_v37  ;;  %1916 = vmatprep.subr.bf16.mxu0 %v5634_v38  ;;  %v5037_v37 = vcombine.low %v2111_v34, %v2115_v35  ;;  %v5038_v38 = vcombine.high %v2111_v34, %v2115_v35  ;;  %v2031_v18 = vld [vmem:[#allocation7 + $0x2c0] sm:$0xff] }
 0x22d   : > { %v2035_v19 = vld [vmem:[#allocation7 + $0x2e0] sm:$0xff] }
 0x22e   : > { %v2183_v34 = vld [vmem:[#allocation7 + $0x780] sm:$0xff] }
 0x22f   : > { %1876 = vmatpush2.bf16.msra.mxu1 %v5629_v39  ;;  %1917 = vmatpush2.bf16.msra.mxu0 %v5632_v40  ;;  %v4878_v39 = vcombine.high %v1951_v32, %v1955_v33  ;;  %v1943_v40 = vld [vmem:[#allocation7] sm:$0xff] }
 0x230   : > { %1877 = vmatprep.subr.bf16.mxu1 %v5637_v41  ;;  %1918 = vmatprep.subr.bf16.mxu0 %v5640_v42  ;;  %v1947_v41 = vld [vmem:[#allocation7 + $0x20] sm:$0xff] }
 0x231   : > { %v2103_v42 = vld [vmem:[#allocation7 + $0x500] sm:$0xff] }
 0x232   : > { %v2187_v35 = vld [vmem:[#allocation7 + $0x7a0] sm:$0xff] }
 0x233   : > { %1878 = vmatpush2.bf16.msra.mxu1 %v5635_v43  ;;  %1919 = vmatpush2.bf16.msra.mxu0 %v5638_v44  ;;  %v2107_v43 = vld [vmem:[#allocation7 + $0x520] sm:$0xff]  ;;  %v4877_v44 = vcombine.low %v1951_v32, %v1955_v33 }
 0x234   : > { %1879 = vmatprep.subr.bf16.mxu1 %v5643_v45  ;;  %1920 = vmatprep.subr.bf16.mxu0 %v5646_v46  ;;  %v5029_v45 = vcombine.low %v2103_v42, %v2107_v43  ;;  %v5030_v46 = vcombine.high %v2103_v42, %v2107_v43  ;;  %v2023_v32 = vld [vmem:[#allocation7 + $0x280] sm:$0xff] }
 0x235   : > { %v2027_v33 = vld [vmem:[#allocation7 + $0x2a0] sm:$0xff] }
 0x236   : > { %v2175_v42 = vld [vmem:[#allocation7 + $0x740] sm:$0xff] }
 0x237   : > { %1880 = vmatpush2.bf16.msra.mxu1 %v5641_v47  ;;  %1921 = vmatpush2.bf16.msra.mxu0 %v5644_v48  ;;  %v4870_v47 = vcombine.high %v1943_v40, %v1947_v41  ;;  %v2063_v48 = vld [vmem:[#allocation7 + $0x3c0] sm:$0xff] }
 0x238   : > { %1881 = vmatprep.subr.bf16.mxu1 %v5649_v49  ;;  %1922 = vmatprep.subr.bf16.mxu0 %v5652_v50  ;;  %v2067_v49 = vld [vmem:[#allocation7 + $0x3e0] sm:$0xff] }
 0x239   : > { %v2095_v50 = vld [vmem:[#allocation7 + $0x4c0] sm:$0xff]  ;;  %v4990_v57 = vcombine.high %v2063_v48, %v2067_v49  ;;  %v4989_v62 = vcombine.low %v2063_v48, %v2067_v49 }
 0x23a   : > { %v2179_v43 = vld [vmem:[#allocation7 + $0x760] sm:$0xff] }
 0x23b   : > { %1882 = vmatpush2.bf16.msra.mxu1 %v5647_v51  ;;  %1923 = vmatpush2.bf16.msra.mxu0 %v5650_v52  ;;  %v2099_v51 = vld [vmem:[#allocation7 + $0x4e0] sm:$0xff]  ;;  %v4869_v52 = vcombine.low %v1943_v40, %v1947_v41 }
 0x23c   : > { %1883 = vmatprep.subr.bf16.mxu1 %v5655_v53  ;;  %1924 = vmatprep.subr.bf16.mxu0 %v5658_v56  ;;  %v5021_v53 = vcombine.low %v2095_v50, %v2099_v51  ;;  %v5022_v56 = vcombine.high %v2095_v50, %v2099_v51  ;;  %v2015_v40 = vld [vmem:[#allocation7 + $0x240] sm:$0xff] }
 0x23d   : > { %v2019_v41 = vld [vmem:[#allocation7 + $0x260] sm:$0xff] }
 0x23e   : > { %v2007_v48 = vld [vmem:[#allocation7 + $0x200] sm:$0xff] }
 0x23f   : > { %1884 = vmatpush2.bf16.msra.mxu1 %v5653_v59  ;;  %1925 = vmatpush2.bf16.msra.mxu0 %v5656_v60  ;;  %v2059_v59 = vld [vmem:[#allocation7 + $0x3a0] sm:$0xff] }
 0x240   : > { %3521 = vmatprep.subr.bf16.mxu1 %v4926_v61  ;;  %v2087_v60 = vld [vmem:[#allocation7 + $0x480] sm:$0xff]  ;;  %v4981_v6 = vcombine.low %v2055_v58, %v2059_v59 }
 0x241   : > { %v2091_v61 = vld [vmem:[#allocation7 + $0x4a0] sm:$0xff] }
 0x242   : > { %1886 = vmatmul.mubr.bf16.vlgmr.msra.gmra.mxu1 %v6110_v54  ;;  %1927 = vmatmul.mubr.bf16.vlgmr.msra.gmra.mxu0 %v6112_v55  ;;  %v5054_v54 = vcombine.high %v2127_v12, %v2131_v13  ;;  %v6120_v55 = vld [vmem:[#allocation7 + $0x1e8] sm:$0xff]  ;;  %v5013_v63 = vcombine.low %v2087_v60, %v2091_v61  ;;  %v2071_v12 = vld [vmem:[#allocation7 + $0x400] sm:$0xff] }
 0x243   : > { %3522 = vmatpush1.bf16.msra.mxu1 %v4925_v0  ;;  %v4927_v20 = vcombine.low %v6118_v16, %v6120_v55  ;;  %v5014_v0 = vcombine.high %v2087_v60, %v2091_v61  ;;  %v2075_v13 = vld [vmem:[#allocation7 + $0x420] sm:$0xff] }
 0x244   : > { %3523 = vmatprep.subr.bf16.mxu1 %v4918_v1  ;;  %3562 = vmatprep.subr.bf16.mxu0 %v5054_v54  ;;  %v4982_v1 = vcombine.high %v2055_v58, %v2059_v59  ;;  %v4998_v54 = vcombine.high %v2071_v12, %v2075_v13  ;;  %v2011_v49 = vld [vmem:[#allocation7 + $0x220] sm:$0xff] }
 0x245   : > { %3563 = vmatpush1.bf16.msra.mxu0 %v5053_v15  ;;  %v4997_v15 = vcombine.low %v2071_v12, %v2075_v13  ;;  %v2167_v50 = vld [vmem:[#allocation7 + $0x700] sm:$0xff]  ;;  %v4933_v60 = vcombine.low %v2007_v48, %v2011_v49  ;;  %v6126_v12 = vld [vmem:[#allocation7 + $0x5c8] sm:$0xff] }
 0x246   : > { %3564 = vmatprep.subr.bf16.mxu0 %v5046_v30  ;;  %v5118_v30 = vcombine.high %v2191_v21, %v2195_v22  ;;  %v2171_v51 = vld [vmem:[#allocation7 + $0x720] sm:$0xff]  ;;  %v6128_v13 = vld [vmem:[#allocation7 + $0x5e8] sm:$0xff] }
 0x247   : > { %3524 = vmatpush1.bf16.msra.mxu1 %v4917_v4  ;;  %v2079_v4 = vld [vmem:[#allocation7 + $0x440] sm:$0xff] }
 0x248   : > { %3525 = vmatprep.subr.bf16.mxu1 %v4910_v5  ;;  %v2083_v5 = vld [vmem:[#allocation7 + $0x460] sm:$0xff] }
 0x249   : > { %3565 = vmatpush1.bf16.msra.mxu0 %v5045_v27  ;;  %v5005_v7 = vcombine.low %v2079_v4, %v2083_v5  ;;  %v5117_v27 = vcombine.low %v2191_v21, %v2195_v22  ;;  %v2159_v58 = vld [vmem:[#allocation7 + $0x6c0] sm:$0xff] }
 0x24a   : > { %3566 = vmatprep.subr.bf16.mxu0 %v5038_v38  ;;  %v5110_v38 = vcombine.high %v2183_v34, %v2187_v35  ;;  %v2163_v59 = vld [vmem:[#allocation7 + $0x6e0] sm:$0xff] }
 0x24b   : > { %3526 = vmatpush1.bf16.msra.mxu1 %v4909_v8  ;;  %v5006_v8 = vcombine.high %v2079_v4, %v2083_v5  ;;  %v5085_v61 = vcombine.low %v2159_v58, %v2163_v59  ;;  %v2143_v4 = vld [vmem:[#allocation7 + $0x640] sm:$0xff] }
 0x24c   : > { %3527 = vmatprep.subr.bf16.mxu1 %v4902_v9  ;;  %v4974_v9 = vcombine.high %v2047_v2, %v2051_v3  ;;  %v2147_v5 = vld [vmem:[#allocation7 + $0x660] sm:$0xff] }
 0x24d   : > { %3567 = vmatpush1.bf16.msra.mxu0 %v5037_v37  ;;  %v5109_v37 = vcombine.low %v2183_v34, %v2187_v35 }
 0x24e   : > { %3568 = vmatprep.subr.bf16.mxu0 %v5030_v46  ;;  %v5102_v46 = vcombine.high %v2175_v42, %v2179_v43 }
 0x24f   : > { %3528 = vmatpush1.bf16.msra.mxu1 %v4901_v14  ;;  %v4973_v14 = vcombine.low %v2047_v2, %v2051_v3 }
 0x250   : > { %3529 = vmatprep.subr.bf16.mxu1 %v4894_v17  ;;  %v4966_v17 = vcombine.high %v2039_v10, %v2043_v11 }
 0x251   : > { %3569 = vmatpush1.bf16.msra.mxu0 %v5029_v45  ;;  %v5101_v45 = vcombine.low %v2175_v42, %v2179_v43 }
 0x252   : > { %3570 = vmatprep.subr.bf16.mxu0 %v5022_v56  ;;  %v5094_v56 = vcombine.high %v2167_v50, %v2171_v51 }
 0x253   : > { %3530 = vmatpush1.bf16.msra.mxu1 %v4893_v23  ;;  %v4965_v23 = vcombine.low %v2039_v10, %v2043_v11 }
 0x254   : > { %3531 = vmatprep.subr.bf16.mxu1 %v4886_v31  ;;  %v4958_v31 = vcombine.high %v2031_v18, %v2035_v19 }
 0x255   : > { %3571 = vmatpush1.bf16.msra.mxu0 %v5021_v53  ;;  %v5093_v53 = vcombine.low %v2167_v50, %v2171_v51 }
 0x256   : > { %3572 = vmatprep.subr.bf16.mxu0 %v5014_v0  ;;  %v2151_v0 = vld [vmem:[#allocation7 + $0x680] sm:$0xff] }
 0x257   : > { %3532 = vmatpush1.bf16.msra.mxu1 %v4885_v36  ;;  %v4957_v36 = vcombine.low %v2031_v18, %v2035_v19 }
 0x258   : > { %3533 = vmatprep.subr.bf16.mxu1 %v4878_v39  ;;  %v4950_v39 = vcombine.high %v2023_v32, %v2027_v33 }
 0x259   : > { %3573 = vmatpush1.bf16.msra.mxu0 %v5013_v63  ;;  %v4928_v63 = vcombine.high %v6118_v16, %v6120_v55  ;;  %v1964_v16 = vld [vmem:[#allocation7 + $0xa8] sm:$0xff] }
 0x25a   : > { %3574 = vmatprep.subr.bf16.mxu0 %v5006_v8  ;;  %v2135_v8 = vld [vmem:[#allocation7 + $0x600] sm:$0xff] }
 0x25b   : > { %3534 = vmatpush1.bf16.msra.mxu1 %v4877_v44  ;;  %v4949_v44 = vcombine.low %v2023_v32, %v2027_v33 }
 0x25c   : > { %3535 = vmatprep.subr.bf16.mxu1 %v4870_v47  ;;  %v4942_v47 = vcombine.high %v2015_v40, %v2019_v41 }
 0x25d   : > { %3575 = vmatpush1.bf16.msra.mxu0 %v5005_v7  ;;  %v5069_v7 = vcombine.low %v2143_v4, %v2147_v5 }
 0x25e   : > { %3576 = vmatprep.subr.bf16.mxu0 %v4998_v54  ;;  %v6137_v54 = vld [vmem:[%s6258_s5] sm:$0xf] }
 0x25f   : > { %3536 = vmatpush1.bf16.msra.mxu1 %v4869_v52  ;;  %v4941_v52 = vcombine.low %v2015_v40, %v2019_v41  ;;  %v1118_v18 = vrot.slane %v6137_v54, %v6101_v28  ;;  %v1996_v40 = vld [vmem:[#allocation7 + $0x1a8] sm:$0xff] }
 0x260   : > { %3537 = vmatprep.subr.bf16.mxu1 %v4990_v57  ;;  %v4934_v57 = vcombine.high %v2007_v48, %v2011_v49  ;;  %v1976_v48 = vld [vmem:[#allocation7 + $0x108] sm:$0xff] }
 0x261   : > { %3577 = vmatpush1.bf16.msra.mxu0 %v4997_v15  ;;  %v5055_v15 = vcombine.low %v6126_v12, %v6128_v13  ;;  %v1980_v49 = vld [vmem:[#allocation7 + $0x128] sm:$0xff] }
 0x262   : > { %3578 = vmatprep.subr.bf16.mxu0 %v5118_v30  ;;  %v4904_v51 = vcombine.high %v1976_v48, %v1980_v49 }
 0x263   : > { %3538 = vmatpush2.bf16.msra.mxu1 %v4989_v62  ;;  %v5086_v62 = vcombine.high %v2159_v58, %v2163_v59  ;;  %v1960_v58 = vld [vmem:[#allocation7 + $0x88] sm:$0xff] }
 0x264   : > { %3539 = vmatprep.subr.bf16.mxu1 %v4982_v1  ;;  %v2155_v1 = vld [vmem:[#allocation7 + $0x6a0] sm:$0xff]  ;;  %v1952_v59 = vld [vmem:[#allocation7 + $0x48] sm:$0xff] }
 0x265   : > { %3579 = vmatpush2.bf16.msra.mxu0 %v5117_v27  ;;  %v5077_v2 = vcombine.low %v2151_v0, %v2155_v1  ;;  %v5078_v3 = vcombine.high %v2151_v0, %v2155_v1  ;;  %v1948_v0 = vld [vmem:[#allocation7 + $0x28] sm:$0xff] }
 0x266   : > { %3580 = vmatprep.subr.bf16.mxu0 %v5110_v38 }
 0x267   : > { %3540 = vmatpush2.bf16.msra.mxu1 %v4981_v6  ;;  %v5070_v6 = vcombine.high %v2143_v4, %v2147_v5  ;;  %v2068_v4 = vld [vmem:[#allocation7 + $0x3e8] sm:$0xff] }
 0x268   : > { %3541 = vmatprep.subr.bf16.mxu1 %v4974_v9  ;;  %v2139_v9 = vld [vmem:[#allocation7 + $0x620] sm:$0xff] }
 0x269   : > { %3581 = vmatpush2.bf16.msra.mxu0 %v5109_v37  ;;  %v5062_v10 = vcombine.high %v2135_v8, %v2139_v9  ;;  %v5061_v11 = vcombine.low %v2135_v8, %v2139_v9  ;;  %v2060_v8 = vld [vmem:[#allocation7 + $0x3a8] sm:$0xff] }
 0x26a   : > { %3582 = vmatprep.subr.bf16.mxu0 %v5102_v46 }
 0x26b   : > { %3542 = vmatpush2.bf16.msra.mxu1 %v4973_v14  ;;  %v5056_v14 = vcombine.high %v6126_v12, %v6128_v13 }
 0x26c   : > { %3543 = vmatprep.subr.bf16.mxu1 %v4966_v17  ;;  %v1114_v17 = vrot.slane %v6137_v54, %v6092_v25 }
 0x26d   : > { %3583 = vmatpush2.bf16.msra.mxu0 %v5101_v45  ;;  %v1988_v45 = vld [vmem:[#allocation7 + $0x168] sm:$0xff] }
 0x26e   : > { %3584 = vmatprep.subr.bf16.mxu0 %v5094_v56  ;;  %v4903_v56 = vcombine.low %v1976_v48, %v1980_v49 }
 0x26f   : > { %3544 = vmatpush2.bf16.msra.mxu1 %v4965_v23 }
 0x270   : > { %3545 = vmatprep.subr.bf16.mxu1 %v4958_v31 }
 0x271   : > { %3585 = vmatpush2.bf16.msra.mxu0 %v5093_v53  ;;  %v1972_v53 = vld [vmem:[#allocation7 + $0xe8] sm:$0xff] }
 0x272   : > { %3586 = vmatprep.subr.bf16.mxu0 %v5086_v62 }
 0x273   : > { %3546 = vmatpush2.bf16.msra.mxu1 %v4957_v36 }
 0x274   : > { %3547 = vmatprep.subr.bf16.mxu1 %v4950_v39  ;;  %v1992_v39 = vld [vmem:[#allocation7 + $0x188] sm:$0xff] }
 0x275   : > { %3587 = vmatpush2.bf16.msra.mxu0 %v5085_v61  ;;  %v4920_v43 = vcombine.high %v1992_v39, %v1996_v40  ;;  %v4919_v46 = vcombine.low %v1992_v39, %v1996_v40  ;;  %v4887_v61 = vcombine.low %v1960_v58, %v1964_v16  ;;  %v1122_v39 = vrot.slane %v6137_v54, %v6095_v26 }
 0x276   : > { %3588 = vmatprep.subr.bf16.mxu0 %v5078_v3  ;;  %v2064_v3 = vld [vmem:[#allocation7 + $0x3c8] sm:$0xff] }
 0x277   : > { %3548 = vmatpush2.bf16.msra.mxu1 %v4949_v44  ;;  %v1984_v44 = vld [vmem:[#allocation7 + $0x148] sm:$0xff]  ;;  %v4991_v9 = vcombine.low %v2064_v3, %v2068_v4 }
 0x278   : > { %3549 = vmatprep.subr.bf16.mxu1 %v4942_v47  ;;  %v4912_v47 = vcombine.high %v1984_v44, %v1988_v45  ;;  %v4911_v50 = vcombine.low %v1984_v44, %v1988_v45  ;;  %v1126_v44 = vrot.slane %v6137_v54, %v6104_v29  ;;  %v2008_v45 = vld [vmem:[#allocation7 + $0x208] sm:$0xff] }
 0x279   : > { %3589 = vmatpush2.bf16.msra.mxu0 %v5077_v2 }
 0x27a   : > { %3590 = vmatprep.subr.bf16.mxu0 %v5070_v6  ;;  %v4992_v6 = vcombine.high %v2064_v3, %v2068_v4  ;;  %v1993_v3 = vld [vmem:[#allocation7 + $0x190] sm:$0xff] }
 0x27b   : > { %3550 = vmatpush2.bf16.msra.mxu1 %v4941_v52  ;;  %v1968_v52 = vld [vmem:[#allocation7 + $0xc8] sm:$0xff]  ;;  %v1997_v4 = vld [vmem:[#allocation7 + $0x1b0] sm:$0xff] }
 0x27c   : > { %3551 = vmatprep.subr.bf16.mxu1 %v4934_v57  ;;  %v4896_v57 = vcombine.high %v1968_v52, %v1972_v53  ;;  %v4895_v55 = vcombine.low %v1968_v52, %v1972_v53 }
 0x27d   : > { %3591 = vmatpush2.bf16.msra.mxu0 %v5069_v7  ;;  %v2056_v7 = vld [vmem:[#allocation7 + $0x388] sm:$0xff] }
 0x27e   : > { %3592 = vmatprep.subr.bf16.mxu0 %v5062_v10  ;;  %v4984_v10 = vcombine.high %v2056_v7, %v2060_v8 }
 0x27f   : > { %3552 = vmatpush2.bf16.msra.mxu1 %v4933_v60  ;;  %v1956_v60 = vld [vmem:[#allocation7 + $0x68] sm:$0xff] }
 0x280   : > { %3603 = vmatprep.subr.bf16.mxu1 %v4928_v63  ;;  %v4880_v62 = vcombine.high %v1952_v59, %v1956_v60  ;;  %v1944_v63 = vld [vmem:[#allocation7 + $0x8] sm:$0xff]  ;;  %v4879_v1 = vcombine.low %v1952_v59, %v1956_v60 }
 0x281   : > { %3593 = vmatpush2.bf16.msra.mxu0 %v5061_v11  ;;  %v4872_v2 = vcombine.high %v1944_v63, %v1948_v0  ;;  %v4871_v5 = vcombine.low %v1944_v63, %v1948_v0  ;;  %v2048_v11 = vld [vmem:[#allocation7 + $0x348] sm:$0xff] }
 0x282   : > { %3644 = vmatprep.subr.bf16.mxu0 %v5056_v14  ;;  %v2052_v14 = vld [vmem:[#allocation7 + $0x368] sm:$0xff] }
 0x2c2   : > { %v1805_v19 = vpop.f32.mrf.mxu1  ;;  %v1846_v21 = vpop.f32.mrf.mxu0 }
 0x2c3   : > { %v1806_v22 = vadd.f32 %v1805_v19, %v1114_v17  ;;  %v4983_v17 = vcombine.low %v2056_v7, %v2060_v8  ;;  %v2040_v19 = vld [vmem:[#allocation7 + $0x308] sm:$0xff] }
 0x2c4   : > { %v1807_v23 = vpop.f32.mrf.mxu1  ;;  %v1848_v27 = vpop.f32.mrf.mxu0 }
 0x2c5   : > { %v1847_v30 = vadd.f32 %v1846_v21, %v1806_v22  ;;  %v1808_v31 = vadd.f32 %v1807_v23, %v1118_v18  ;;  %v4976_v18 = vcombine.high %v2048_v11, %v2052_v14  ;;  %v2044_v21 = vld [vmem:[#allocation7 + $0x328] sm:$0xff]  ;;  %v4975_v22 = vcombine.low %v2048_v11, %v2052_v14  ;;  %v1985_v14 = vld [vmem:[#allocation7 + $0x150] sm:$0xff] }
 0x2c6   : > { %v1809_v32 = vpop.f32.mrf.mxu1  ;;  %v1850_v33 = vpop.f32.mrf.mxu0  ;;  %v4968_v23 = vcombine.high %v2040_v19, %v2044_v21  ;;  %v2116_v11 = vld [vmem:[#allocation7 + $0x568] sm:$0xff] }
 0x2c7   : > { %v1849_v34 = vadd.f32 %v1848_v27, %v1808_v31  ;;  %v1935_v35 = vmax.f32 %v1847_v30, 0.0  ;;  %v2032_v27 = vld [vmem:[#allocation7 + $0x2c8] sm:$0xff]  ;;  %v4967_v31 = vcombine.low %v2040_v19, %v2044_v21  ;;  %v4921_v19 = vcombine.low %v1993_v3, %v1997_v4 }
 0x2c8   : > { %v1810_v36 = vpop.f32.mrf.mxu1  ;;  %v1851_v37 = vpop.f32.mrf.mxu0  ;;  %v2036_v30 = vld [vmem:[#allocation7 + $0x2e8] sm:$0xff] }
 0x2c9   : > { %v1936_v38 = vmax.f32 %v1849_v34, 0.0  ;;  %v6145_v42 = vpack.c.bf16 %v1935_v35, %v1935_v35  ;;  %v4960_v32 = vcombine.high %v2032_v27, %v2036_v30  ;;  %v2024_v33 = vld [vmem:[#allocation7 + $0x288] sm:$0xff]  ;;  %v4959_v35 = vcombine.low %v2032_v27, %v2036_v30  ;;  %v1977_v30 = vld [vmem:[#allocation7 + $0x110] sm:$0xff] }
 0x2ca   : > { %v2028_v34 = vld [vmem:[#allocation7 + $0x2a8] sm:$0xff] }
 0x2cb   : > { %v6143_v41 = vpack.c.bf16 %v1936_v38, %v1936_v38  ;;  %v4952_v36 = vcombine.high %v2024_v33, %v2028_v34  ;;  %v2016_v37 = vld [vmem:[#allocation7 + $0x248] sm:$0xff]  ;;  %v4951_v40 = vcombine.low %v2024_v33, %v2028_v34 }
 0x2cc   : > { %v2020_v38 = vld [vmem:[#allocation7 + $0x268] sm:$0xff] }
 0x2cd   : > { %3553 = vmatprep.mubr.bf16.mxu1 %v6143_v41  ;;  %v2108_v27 = vld [vmem:[#allocation7 + $0x528] sm:$0xff] }
 0x2ce   : > { %3554 = vmatmul.mubr.bf16.vlgmr.msra.gmra.mxu1 %v6145_v42  ;;  %v2096_v33 = vld [vmem:[#allocation7 + $0x4c8] sm:$0xff] }
 0x2cf   : > { %3604 = vmatpush1.bf16.msra.mxu1 %v4927_v20  ;;  %3635 = vmatprep.mubr.bf16.mxu1 %v6143_v41  ;;  %v4888_v20 = vcombine.high %v1960_v58, %v1964_v16  ;;  %v2001_v58 = vld [vmem:[#allocation7 + $0x1d0] sm:$0xff]  ;;  %v2100_v34 = vld [vmem:[#allocation7 + $0x4e8] sm:$0xff] }
 0x2d0   : > { %3605 = vmatprep.subr.bf16.mxu1 %v4920_v43  ;;  %v4944_v43 = vcombine.high %v2016_v37, %v2020_v38  ;;  %v2005_v16 = vld [vmem:[#allocation7 + $0x1f0] sm:$0xff] }
 0x2d1   : > { %v4930_v63 = vcombine.high %v2001_v58, %v2005_v16  ;;  %v4929_v7 = vcombine.low %v2001_v58, %v2005_v16 }
 0x2d3   : > { %3606 = vmatpush1.bf16.msra.mxu1 %v4919_v46  ;;  %v2012_v46 = vld [vmem:[#allocation7 + $0x228] sm:$0xff] }
 0x2d4   : > { %3607 = vmatprep.subr.bf16.mxu1 %v4912_v47  ;;  %v4936_v53 = vcombine.high %v2008_v45, %v2012_v46  ;;  %v4935_v54 = vcombine.low %v2008_v45, %v2012_v46  ;;  %v1961_v45 = vld [vmem:[#allocation7 + $0x90] sm:$0xff] }
 0x2d5   : > { %v1965_v46 = vld [vmem:[#allocation7 + $0xb0] sm:$0xff] }
 0x2d6   : > { %v4889_v58 = vcombine.low %v1961_v45, %v1965_v46 }
 0x2d7   : > { %3608 = vmatpush1.bf16.msra.mxu1 %v4911_v50  ;;  %v4943_v50 = vcombine.low %v2016_v37, %v2020_v38 }
 0x2d8   : > { %3609 = vmatprep.subr.bf16.mxu1 %v4904_v51 }
 0x2db   : > { %3610 = vmatpush1.bf16.msra.mxu1 %v4903_v56 }
 0x2dc   : > { %3611 = vmatprep.subr.bf16.mxu1 %v4896_v57 }
 0x2df   : > { %3612 = vmatpush1.bf16.msra.mxu1 %v4895_v55 }
 0x2e0   : > { %3613 = vmatprep.subr.bf16.mxu1 %v4888_v20 }
 0x2e3   : > { %3614 = vmatpush1.bf16.msra.mxu1 %v4887_v61 }
 0x2e4   : > { %3615 = vmatprep.subr.bf16.mxu1 %v4880_v62 }
 0x2e7   : > { %3616 = vmatpush1.bf16.msra.mxu1 %v4879_v1  ;;  %v2120_v1 = vld [vmem:[#allocation7 + $0x588] sm:$0xff] }
 0x2e8   : > { %3617 = vmatprep.subr.bf16.mxu1 %v4872_v2  ;;  %v2124_v2 = vld [vmem:[#allocation7 + $0x5a8] sm:$0xff] }
 0x2e9   : > { %v5048_v8 = vcombine.high %v2120_v1, %v2124_v2 }
 0x2eb   : > { %3618 = vmatpush1.bf16.msra.mxu1 %v4871_v5 }
 0x2ec   : > { %3619 = vmatprep.subr.bf16.mxu1 %v4992_v6 }
 0x2ef   : > { %3620 = vmatpush2.bf16.msra.mxu1 %v4991_v9  ;;  %v4922_v9 = vcombine.high %v1993_v3, %v1997_v4  ;;  %v2065_v3 = vld [vmem:[#allocation7 + $0x3d0] sm:$0xff] }
 0x2f0   : > { %3621 = vmatprep.subr.bf16.mxu1 %v4984_v10  ;;  %v2112_v10 = vld [vmem:[#allocation7 + $0x548] sm:$0xff]  ;;  %v2069_v4 = vld [vmem:[#allocation7 + $0x3f0] sm:$0xff] }
 0x2f1   : > { %v5040_v21 = vcombine.high %v2112_v10, %v2116_v11 }
 0x2f3   : > { %3622 = vmatpush2.bf16.msra.mxu1 %v4983_v17  ;;  %v1989_v17 = vld [vmem:[#allocation7 + $0x170] sm:$0xff] }
 0x2f4   : > { %3623 = vmatprep.subr.bf16.mxu1 %v4976_v18  ;;  %v5047_v18 = vcombine.low %v2120_v1, %v2124_v2  ;;  %v4913_v12 = vcombine.low %v1985_v14, %v1989_v17  ;;  %v2192_v1 = vld [vmem:[#allocation7 + $0x7c8] sm:$0xff] }
 0x2f5   : > { %v2196_v2 = vld [vmem:[#allocation7 + $0x7e8] sm:$0xff] }
 0x2f7   : > { %3624 = vmatpush2.bf16.msra.mxu1 %v4975_v22  ;;  %v4914_v22 = vcombine.high %v1985_v14, %v1989_v17  ;;  %v2188_v14 = vld [vmem:[#allocation7 + $0x7a8] sm:$0xff]  ;;  %v2057_v17 = vld [vmem:[#allocation7 + $0x390] sm:$0xff] }
 0x2f8   : > { %3625 = vmatprep.subr.bf16.mxu1 %v4968_v23  ;;  %v2104_v23 = vld [vmem:[#allocation7 + $0x508] sm:$0xff] }
 0x2f9   : > { %v5032_v13 = vcombine.high %v2104_v23, %v2108_v27  ;;  %v5031_v37 = vcombine.low %v2104_v23, %v2108_v27  ;;  %v2176_v27 = vld [vmem:[#allocation7 + $0x748] sm:$0xff] }
 0x2fb   : > { %3626 = vmatpush2.bf16.msra.mxu1 %v4967_v31  ;;  %v1981_v31 = vld [vmem:[#allocation7 + $0x130] sm:$0xff] }
 0x2fc   : > { %3627 = vmatprep.subr.bf16.mxu1 %v4960_v32  ;;  %v5039_v32 = vcombine.low %v2112_v10, %v2116_v11  ;;  %v4905_v38 = vcombine.low %v1977_v30, %v1981_v31  ;;  %v4994_v10 = vcombine.high %v2065_v3, %v2069_v4  ;;  %v2184_v11 = vld [vmem:[#allocation7 + $0x788] sm:$0xff] }
 0x2ff   : > { %3628 = vmatpush2.bf16.msra.mxu1 %v4959_v35  ;;  %v1969_v35 = vld [vmem:[#allocation7 + $0xd0] sm:$0xff] }
 0x300   : > { %3629 = vmatprep.subr.bf16.mxu1 %v4952_v36  ;;  %v1973_v36 = vld [vmem:[#allocation7 + $0xf0] sm:$0xff] }
 0x302   : > { %v1887_v47 = vpop.f32.mrf.mxu1  ;;  %v1928_v48 = vpop.f32.mrf.mxu0 }
 0x303   : > { %v1888_v49 = vadd.f32 %v1887_v47, %v1122_v39  ;;  %3630 = vmatpush2.bf16.msra.mxu1 %v4951_v40  ;;  %v5024_v39 = vcombine.high %v2096_v33, %v2100_v34  ;;  %v4898_v40 = vcombine.high %v1969_v35, %v1973_v36  ;;  %v5023_v47 = vcombine.low %v2096_v33, %v2100_v34  ;;  %v2168_v34 = vld [vmem:[#allocation7 + $0x708] sm:$0xff] }
 0x304   : > { %v1889_v51 = vpop.f32.mrf.mxu1  ;;  %v1930_v52 = vpop.f32.mrf.mxu0  ;;  %3631 = vmatprep.subr.bf16.mxu1 %v4944_v43  ;;  %v2088_v43 = vld [vmem:[#allocation7 + $0x488] sm:$0xff] }
 0x305   : > { %v1929_v56 = vadd.f32 %v1928_v48, %v1888_v49  ;;  %v1890_v57 = vadd.f32 %v1889_v51, %v1126_v44  ;;  %v2092_v44 = vld [vmem:[#allocation7 + $0x4a8] sm:$0xff]  ;;  %v4897_v48 = vcombine.low %v1969_v35, %v1973_v36  ;;  %v2041_v36 = vld [vmem:[#allocation7 + $0x310] sm:$0xff] }
 0x306   : > { %v1891_v55 = vpop.f32.mrf.mxu1  ;;  %v1932_v20 = vpop.f32.mrf.mxu0  ;;  %v5016_v49 = vcombine.high %v2088_v43, %v2092_v44  ;;  %v2080_v51 = vld [vmem:[#allocation7 + $0x448] sm:$0xff] }
 0x307   : > { %v1931_v59 = vadd.f32 %v1930_v52, %v1890_v57  ;;  %3632 = vmatpush2.bf16.msra.mxu1 %v4943_v50  ;;  %v1937_v60 = vmax.f32 %v1929_v56, 0.0  ;;  %v4890_v50 = vcombine.high %v1961_v45, %v1965_v46  ;;  %v2084_v52 = vld [vmem:[#allocation7 + $0x468] sm:$0xff]  ;;  %v1957_v56 = vld [vmem:[#allocation7 + $0x70] sm:$0xff]  ;;  %v5015_v57 = vcombine.low %v2088_v43, %v2092_v44 }
 0x308   : > { %v1892_v61 = vpop.f32.mrf.mxu1  ;;  %v1933_v62 = vpop.f32.mrf.mxu0  ;;  %3633 = vmatprep.subr.bf16.mxu1 %v4936_v53  ;;  %v1953_v53 = vld [vmem:[#allocation7 + $0x50] sm:$0xff]  ;;  %v5008_v16 = vcombine.high %v2080_v51, %v2084_v52  ;;  %v2072_v20 = vld [vmem:[#allocation7 + $0x408] sm:$0xff] }
 0x309   : > { %v1938_v0 = vmax.f32 %v1931_v59, 0.0  ;;  %v6159_v6 = vpack.c.bf16 %v1937_v60, %v1937_v60  ;;  %v4882_v55 = vcombine.high %v1953_v53, %v1957_v56  ;;  %v2076_v59 = vld [vmem:[#allocation7 + $0x428] sm:$0xff]  ;;  %v1949_v60 = vld [vmem:[#allocation7 + $0x30] sm:$0xff]  ;;  %v5007_v61 = vcombine.low %v2080_v51, %v2084_v52 }
 0x30a   : > { %v4881_v62 = vcombine.low %v1953_v53, %v1957_v56  ;;  %v2172_v35 = vld [vmem:[#allocation7 + $0x728] sm:$0xff]  ;;  %v2033_v46 = vld [vmem:[#allocation7 + $0x2d0] sm:$0xff] }
 0x30b   : > { %v6157_v5 = vpack.c.bf16 %v1938_v0, %v1938_v0  ;;  %3634 = vmatpush2.bf16.msra.mxu1 %v4935_v54  ;;  %v1945_v54 = vld [vmem:[#allocation7 + $0x10] sm:$0xff]  ;;  %v2160_v44 = vld [vmem:[#allocation7 + $0x6c8] sm:$0xff] }
 0x30c   : > { %3685 = vmatprep.subr.bf16.mxu1 %v4930_v63  ;;  %v5000_v63 = vcombine.high %v2072_v20, %v2076_v59  ;;  %v4874_v0 = vcombine.high %v1945_v54, %v1949_v60  ;;  %v2164_v45 = vld [vmem:[#allocation7 + $0x6e8] sm:$0xff]  ;;  %v2025_v56 = vld [vmem:[#allocation7 + $0x290] sm:$0xff] }
 0x30d   : > { %3594 = vmatprep.mubr.bf16.mxu0 %v6157_v5  ;;  %v2152_v52 = vld [vmem:[#allocation7 + $0x688] sm:$0xff] }
 0x30e   : > { %3595 = vmatmul.mubr.bf16.vlgmr.msra.gmra.mxu0 %v6159_v6  ;;  %3636 = vmatmul.mubr.bf16.vlgmr.msra.gmra.mxu1 %v6145_v42  ;;  %v2156_v53 = vld [vmem:[#allocation7 + $0x6a8] sm:$0xff] }
 0x30f   : > { %3645 = vmatpush1.bf16.msra.mxu0 %v5055_v15  ;;  %3676 = vmatprep.mubr.bf16.mxu0 %v6157_v5  ;;  %v4906_v15 = vcombine.high %v1977_v30, %v1981_v31  ;;  %v2180_v30 = vld [vmem:[#allocation7 + $0x768] sm:$0xff]  ;;  %v2049_v31 = vld [vmem:[#allocation7 + $0x350] sm:$0xff] }
 0x310   : > { %3686 = vmatpush1.bf16.msra.mxu1 %v4929_v7  ;;  %3717 = vmatprep.mubr.bf16.mxu1 %v6143_v41  ;;  %v4999_v7 = vcombine.low %v2072_v20, %v2076_v59  ;;  %v2144_v59 = vld [vmem:[#allocation7 + $0x648] sm:$0xff] }
 0x311   : > { %3646 = vmatprep.subr.bf16.mxu0 %v5048_v8  ;;  %3687 = vmatprep.subr.bf16.mxu1 %v4922_v9  ;;  %v4873_v8 = vcombine.low %v1945_v54, %v1949_v60  ;;  %v5120_v9 = vcombine.high %v2192_v1, %v2196_v2  ;;  %v2148_v54 = vld [vmem:[#allocation7 + $0x668] sm:$0xff]  ;;  %v2017_v60 = vld [vmem:[#allocation7 + $0x250] sm:$0xff] }
 0x313   : > { %3647 = vmatpush1.bf16.msra.mxu0 %v5047_v18  ;;  %v2061_v18 = vld [vmem:[#allocation7 + $0x3b0] sm:$0xff] }
 0x314   : > { %3688 = vmatpush1.bf16.msra.mxu1 %v4921_v19  ;;  %3648 = vmatprep.subr.bf16.mxu0 %v5040_v21  ;;  %v5119_v19 = vcombine.low %v2192_v1, %v2196_v2  ;;  %v4993_v21 = vcombine.low %v2065_v3, %v2069_v4  ;;  %v4986_v23 = vcombine.high %v2057_v17, %v2061_v18  ;;  %v2136_v2 = vld [vmem:[#allocation7 + $0x608] sm:$0xff]  ;;  %v2009_v4 = vld [vmem:[#allocation7 + $0x210] sm:$0xff] }
 0x315   : > { %3689 = vmatprep.subr.bf16.mxu1 %v4914_v22  ;;  %v5112_v22 = vcombine.high %v2184_v11, %v2188_v14  ;;  %v2140_v3 = vld [vmem:[#allocation7 + $0x628] sm:$0xff] }
 0x317   : > { %3649 = vmatpush1.bf16.msra.mxu0 %v5039_v32  ;;  %v2053_v32 = vld [vmem:[#allocation7 + $0x370] sm:$0xff] }
 0x318   : > { %3690 = vmatpush1.bf16.msra.mxu1 %v4913_v12  ;;  %3650 = vmatprep.subr.bf16.mxu0 %v5032_v13  ;;  %v5111_v12 = vcombine.low %v2184_v11, %v2188_v14  ;;  %v4985_v13 = vcombine.low %v2057_v17, %v2061_v18  ;;  %v4978_v33 = vcombine.high %v2049_v31, %v2053_v32  ;;  %v2129_v14 = vld [vmem:[#allocation7 + $0x5d0] sm:$0xff]  ;;  %v2002_v18 = vld [vmem:[#allocation7 + $0x1d8] sm:$0xff] }
 0x319   : > { %3691 = vmatprep.subr.bf16.mxu1 %v4906_v15  ;;  %v5104_v15 = vcombine.high %v2176_v27, %v2180_v30  ;;  %v2133_v17 = vld [vmem:[#allocation7 + $0x5f0] sm:$0xff] }
 0x31b   : > { %3651 = vmatpush1.bf16.msra.mxu0 %v5031_v37  ;;  %v2045_v37 = vld [vmem:[#allocation7 + $0x330] sm:$0xff] }
 0x31c   : > { %3692 = vmatpush1.bf16.msra.mxu1 %v4905_v38  ;;  %3652 = vmatprep.subr.bf16.mxu0 %v5024_v39  ;;  %v5103_v38 = vcombine.low %v2176_v27, %v2180_v30  ;;  %v4977_v39 = vcombine.low %v2049_v31, %v2053_v32  ;;  %v4970_v43 = vcombine.high %v2041_v36, %v2045_v37  ;;  %v2121_v30 = vld [vmem:[#allocation7 + $0x590] sm:$0xff] }
 0x31d   : > { %3693 = vmatprep.subr.bf16.mxu1 %v4898_v40  ;;  %v5096_v40 = vcombine.high %v2168_v34, %v2172_v35  ;;  %v2125_v31 = vld [vmem:[#allocation7 + $0x5b0] sm:$0xff]  ;;  %v5057_v32 = vcombine.low %v2129_v14, %v2133_v17 }
 0x31f   : > { %3653 = vmatpush1.bf16.msra.mxu0 %v5023_v47  ;;  %v2037_v47 = vld [vmem:[#allocation7 + $0x2f0] sm:$0xff] }
 0x320   : > { %3694 = vmatpush1.bf16.msra.mxu1 %v4897_v48  ;;  %3654 = vmatprep.subr.bf16.mxu0 %v5016_v49  ;;  %v5095_v48 = vcombine.low %v2168_v34, %v2172_v35  ;;  %v4969_v49 = vcombine.low %v2041_v36, %v2045_v37  ;;  %v4962_v51 = vcombine.high %v2033_v46, %v2037_v47  ;;  %v2113_v34 = vld [vmem:[#allocation7 + $0x550] sm:$0xff]  ;;  %v1986_v37 = vld [vmem:[#allocation7 + $0x158] sm:$0xff] }
 0x321   : > { %3695 = vmatprep.subr.bf16.mxu1 %v4890_v50  ;;  %v5088_v50 = vcombine.high %v2160_v44, %v2164_v45  ;;  %v2117_v35 = vld [vmem:[#allocation7 + $0x570] sm:$0xff] }
 0x323   : > { %3655 = vmatpush1.bf16.msra.mxu0 %v5015_v57  ;;  %v2029_v57 = vld [vmem:[#allocation7 + $0x2b0] sm:$0xff] }
 0x324   : > { %3696 = vmatpush1.bf16.msra.mxu1 %v4889_v58  ;;  %3656 = vmatprep.subr.bf16.mxu0 %v5008_v16  ;;  %v5087_v58 = vcombine.low %v2160_v44, %v2164_v45  ;;  %v4961_v16 = vcombine.low %v2033_v46, %v2037_v47  ;;  %v4954_v20 = vcombine.high %v2025_v56, %v2029_v57  ;;  %v2105_v45 = vld [vmem:[#allocation7 + $0x510] sm:$0xff]  ;;  %v1978_v47 = vld [vmem:[#allocation7 + $0x118] sm:$0xff] }
 0x325   : > { %3697 = vmatprep.subr.bf16.mxu1 %v4882_v55  ;;  %v5080_v55 = vcombine.high %v2152_v52, %v2156_v53  ;;  %v2109_v46 = vld [vmem:[#allocation7 + $0x530] sm:$0xff] }
 0x327   : > { %3657 = vmatpush1.bf16.msra.mxu0 %v5007_v61  ;;  %v2021_v61 = vld [vmem:[#allocation7 + $0x270] sm:$0xff] }
 0x328   : > { %3698 = vmatpush1.bf16.msra.mxu1 %v4881_v62  ;;  %3658 = vmatprep.subr.bf16.mxu0 %v5000_v63  ;;  %v5079_v62 = vcombine.low %v2152_v52, %v2156_v53  ;;  %v4953_v63 = vcombine.low %v2025_v56, %v2029_v57  ;;  %v4946_v1 = vcombine.high %v2017_v60, %v2021_v61  ;;  %v2097_v53 = vld [vmem:[#allocation7 + $0x4d0] sm:$0xff]  ;;  %v1970_v57 = vld [vmem:[#allocation7 + $0xd8] sm:$0xff] }
 0x329   : > { %3699 = vmatprep.subr.bf16.mxu1 %v4874_v0  ;;  %v5072_v0 = vcombine.high %v2144_v59, %v2148_v54  ;;  %v2101_v56 = vld [vmem:[#allocation7 + $0x4f0] sm:$0xff] }
 0x32b   : > { %3659 = vmatpush1.bf16.msra.mxu0 %v4999_v7  ;;  %v2013_v7 = vld [vmem:[#allocation7 + $0x230] sm:$0xff] }
 0x32c   : > { %3700 = vmatpush1.bf16.msra.mxu1 %v4873_v8  ;;  %3660 = vmatprep.subr.bf16.mxu0 %v5120_v9  ;;  %v5071_v8 = vcombine.low %v2144_v59, %v2148_v54  ;;  %v4945_v9 = vcombine.low %v2017_v60, %v2021_v61  ;;  %v4938_v11 = vcombine.high %v2009_v4, %v2013_v7  ;;  %v2089_v59 = vld [vmem:[#allocation7 + $0x490] sm:$0xff]  ;;  %v1962_v60 = vld [vmem:[#allocation7 + $0x98] sm:$0xff] }
 0x32d   : > { %3701 = vmatprep.subr.bf16.mxu1 %v4994_v10  ;;  %v5064_v10 = vcombine.high %v2136_v2, %v2140_v3  ;;  %v2093_v54 = vld [vmem:[#allocation7 + $0x4b0] sm:$0xff]  ;;  %v1966_v61 = vld [vmem:[#allocation7 + $0xb8] sm:$0xff] }
 0x32f   : > { %3661 = vmatpush2.bf16.msra.mxu0 %v5119_v19  ;;  %v2006_v19 = vld [vmem:[#allocation7 + $0x1f8] sm:$0xff] }
 0x330   : > { %3702 = vmatpush2.bf16.msra.mxu1 %v4993_v21  ;;  %3662 = vmatprep.subr.bf16.mxu0 %v5112_v22  ;;  %v5063_v21 = vcombine.low %v2136_v2, %v2140_v3  ;;  %v4937_v22 = vcombine.low %v2009_v4, %v2013_v7  ;;  %v4932_v27 = vcombine.high %v2002_v18, %v2006_v19  ;;  %v2081_v2 = vld [vmem:[#allocation7 + $0x450] sm:$0xff]  ;;  %v1954_v4 = vld [vmem:[#allocation7 + $0x58] sm:$0xff] }
 0x331   : > { %3703 = vmatprep.subr.bf16.mxu1 %v4986_v23  ;;  %v5058_v23 = vcombine.high %v2129_v14, %v2133_v17  ;;  %v2085_v3 = vld [vmem:[#allocation7 + $0x470] sm:$0xff]  ;;  %v1958_v7 = vld [vmem:[#allocation7 + $0x78] sm:$0xff] }
 0x332   : > { %v2073_v14 = vld [vmem:[#allocation7 + $0x410] sm:$0xff] }
 0x333   : > { %3663 = vmatpush2.bf16.msra.mxu0 %v5111_v12  ;;  %v1994_v12 = vld [vmem:[#allocation7 + $0x198] sm:$0xff]  ;;  %v2077_v17 = vld [vmem:[#allocation7 + $0x430] sm:$0xff] }
 0x334   : > { %3704 = vmatpush2.bf16.msra.mxu1 %v4985_v13  ;;  %3664 = vmatprep.subr.bf16.mxu0 %v5104_v15  ;;  %v1998_v13 = vld [vmem:[#allocation7 + $0x1b8] sm:$0xff]  ;;  %v4931_v15 = vcombine.low %v2002_v18, %v2006_v19 }
 0x335   : > { %3705 = vmatprep.subr.bf16.mxu1 %v4978_v33  ;;  %v5050_v33 = vcombine.high %v2121_v30, %v2125_v31  ;;  %v4924_v36 = vcombine.high %v1994_v12, %v1998_v13  ;;  %v1946_v18 = vld [vmem:[#allocation7 + $0x18] sm:$0xff] }
 0x336   : > { %v1950_v19 = vld [vmem:[#allocation7 + $0x38] sm:$0xff] }
 0x337   : > { %3665 = vmatpush2.bf16.msra.mxu0 %v5103_v38  ;;  %v1990_v38 = vld [vmem:[#allocation7 + $0x178] sm:$0xff] }
 0x338   : > { %3706 = vmatpush2.bf16.msra.mxu1 %v4977_v39  ;;  %3666 = vmatprep.subr.bf16.mxu0 %v5096_v40  ;;  %v5049_v39 = vcombine.low %v2121_v30, %v2125_v31  ;;  %v4923_v40 = vcombine.low %v1994_v12, %v1998_v13  ;;  %v4916_v44 = vcombine.high %v1986_v37, %v1990_v38  ;;  %v2193_v30 = vld [vmem:[#allocation7 + $0x7d0] sm:$0xff]  ;;  %v2070_v12 = vld [vmem:[#allocation7 + $0x3f8] sm:$0xff] }
 0x339   : > { %3707 = vmatprep.subr.bf16.mxu1 %v4970_v43  ;;  %v5042_v43 = vcombine.high %v2113_v34, %v2117_v35  ;;  %v2197_v31 = vld [vmem:[#allocation7 + $0x7f0] sm:$0xff]  ;;  %v5001_v13 = vcombine.low %v2073_v14, %v2077_v17 }
 0x33b   : > { %3667 = vmatpush2.bf16.msra.mxu0 %v5095_v48  ;;  %v1982_v48 = vld [vmem:[#allocation7 + $0x138] sm:$0xff] }
 0x33c   : > { %3708 = vmatpush2.bf16.msra.mxu1 %v4969_v49  ;;  %3668 = vmatprep.subr.bf16.mxu0 %v5088_v50  ;;  %v5041_v49 = vcombine.low %v2113_v34, %v2117_v35  ;;  %v4915_v50 = vcombine.low %v1986_v37, %v1990_v38  ;;  %v4908_v52 = vcombine.high %v1978_v47, %v1982_v48  ;;  %v2185_v35 = vld [vmem:[#allocation7 + $0x790] sm:$0xff]  ;;  %v2058_v37 = vld [vmem:[#allocation7 + $0x398] sm:$0xff] }
 0x33d   : > { %3709 = vmatprep.subr.bf16.mxu1 %v4962_v51  ;;  %v5034_v51 = vcombine.high %v2105_v45, %v2109_v46  ;;  %v2062_v38 = vld [vmem:[#allocation7 + $0x3b8] sm:$0xff] }
 0x33f   : > { %3669 = vmatpush2.bf16.msra.mxu0 %v5087_v58  ;;  %v1974_v58 = vld [vmem:[#allocation7 + $0xf8] sm:$0xff] }
 0x340   : > { %3710 = vmatpush2.bf16.msra.mxu1 %v4961_v16  ;;  %3670 = vmatprep.subr.bf16.mxu0 %v5080_v55  ;;  %v4907_v16 = vcombine.low %v1978_v47, %v1982_v48  ;;  %v5026_v55 = vcombine.high %v2097_v53, %v2101_v56  ;;  %v2050_v47 = vld [vmem:[#allocation7 + $0x358] sm:$0xff] }
 0x341   : > { %3711 = vmatprep.subr.bf16.mxu1 %v4954_v20  ;;  %v4900_v20 = vcombine.high %v1970_v57, %v1974_v58  ;;  %v2054_v48 = vld [vmem:[#allocation7 + $0x378] sm:$0xff] }
 0x343   : > { %3671 = vmatpush2.bf16.msra.mxu0 %v5079_v62  ;;  %v5025_v62 = vcombine.low %v2097_v53, %v2101_v56  ;;  %v2169_v53 = vld [vmem:[#allocation7 + $0x710] sm:$0xff] }
 0x344   : > { %3712 = vmatpush2.bf16.msra.mxu1 %v4953_v63  ;;  %3672 = vmatprep.subr.bf16.mxu0 %v5072_v0  ;;  %v4899_v63 = vcombine.low %v1970_v57, %v1974_v58  ;;  %v5018_v0 = vcombine.high %v2089_v59, %v2093_v54  ;;  %v2173_v56 = vld [vmem:[#allocation7 + $0x730] sm:$0xff]  ;;  %v2042_v57 = vld [vmem:[#allocation7 + $0x318] sm:$0xff] }
 0x345   : > { %3713 = vmatprep.subr.bf16.mxu1 %v4946_v1  ;;  %v4892_v1 = vcombine.high %v1962_v60, %v1966_v61  ;;  %v2046_v58 = vld [vmem:[#allocation7 + $0x338] sm:$0xff] }
 0x347   : > { %3673 = vmatpush2.bf16.msra.mxu0 %v5071_v8  ;;  %v5017_v8 = vcombine.low %v2089_v59, %v2093_v54  ;;  %v2161_v59 = vld [vmem:[#allocation7 + $0x6d0] sm:$0xff] }
 0x348   : > { %3714 = vmatpush2.bf16.msra.mxu1 %v4945_v9  ;;  %3674 = vmatprep.subr.bf16.mxu0 %v5064_v10  ;;  %v4891_v9 = vcombine.low %v1962_v60, %v1966_v61  ;;  %v5010_v10 = vcombine.high %v2081_v2, %v2085_v3  ;;  %v2165_v54 = vld [vmem:[#allocation7 + $0x6f0] sm:$0xff]  ;;  %v2034_v60 = vld [vmem:[#allocation7 + $0x2d8] sm:$0xff] }
 0x349   : > { %3715 = vmatprep.subr.bf16.mxu1 %v4938_v11  ;;  %v4884_v11 = vcombine.high %v1954_v4, %v1958_v7  ;;  %v2038_v61 = vld [vmem:[#allocation7 + $0x2f8] sm:$0xff] }
 0x34b   : > { %3675 = vmatpush2.bf16.msra.mxu0 %v5063_v21  ;;  %v5009_v21 = vcombine.low %v2081_v2, %v2085_v3  ;;  %v2153_v2 = vld [vmem:[#allocation7 + $0x690] sm:$0xff] }
 0x34c   : > { %3716 = vmatpush2.bf16.msra.mxu1 %v4937_v22  ;;  %3726 = vmatprep.subr.bf16.mxu0 %v5058_v23  ;;  %v4883_v22 = vcombine.low %v1954_v4, %v1958_v7  ;;  %v5002_v23 = vcombine.high %v2073_v14, %v2077_v17  ;;  %v2157_v3 = vld [vmem:[#allocation7 + $0x6b0] sm:$0xff]  ;;  %v2026_v4 = vld [vmem:[#allocation7 + $0x298] sm:$0xff] }
 0x34d   : > { %3767 = vmatprep.subr.bf16.mxu1 %v4932_v27  ;;  %v4876_v27 = vcombine.high %v1946_v18, %v1950_v19  ;;  %v2030_v7 = vld [vmem:[#allocation7 + $0x2b8] sm:$0xff]  ;;  %v2145_v14 = vld [vmem:[#allocation7 + $0x650] sm:$0xff] }
 0x34e   : > { %3677 = vmatmul.mubr.bf16.vlgmr.msra.gmra.mxu0 %v6159_v6  ;;  %v2149_v17 = vld [vmem:[#allocation7 + $0x670] sm:$0xff] }
 0x34f   : > { %3718 = vmatmul.mubr.bf16.vlgmr.msra.gmra.mxu1 %v6145_v42  ;;  %3727 = vmatpush1.bf16.msra.mxu0 %v5057_v32  ;;  %v2066_v32 = vld [vmem:[#allocation7 + $0x3d8] sm:$0xff] }
 0x350   : > { %3758 = vmatprep.mubr.bf16.mxu0 %v6157_v5  ;;  %3768 = vmatpush1.bf16.msra.mxu1 %v4931_v15  ;;  %v4875_v15 = vcombine.low %v1946_v18, %v1950_v19  ;;  %v4996_v34 = vcombine.high %v2066_v32, %v2070_v12  ;;  %v2018_v18 = vld [vmem:[#allocation7 + $0x258] sm:$0xff] }
 0x351   : > { %3799 = vmatprep.mubr.bf16.mxu1 %v6143_v41  ;;  %3728 = vmatprep.subr.bf16.mxu0 %v5050_v33  ;;  %v5033_v41 = vcombine.low %v2105_v45, %v2109_v46  ;;  %v5122_v33 = vcombine.high %v2193_v30, %v2197_v31  ;;  %v2177_v45 = vld [vmem:[#allocation7 + $0x750] sm:$0xff]  ;;  %v2022_v19 = vld [vmem:[#allocation7 + $0x278] sm:$0xff] }
 0x352   : > { %3769 = vmatprep.subr.bf16.mxu1 %v4924_v36  ;;  %v2189_v36 = vld [vmem:[#allocation7 + $0x7b0] sm:$0xff] }
 0x353   : > { %3729 = vmatpush1.bf16.msra.mxu0 %v5049_v39  ;;  %v5121_v39 = vcombine.low %v2193_v30, %v2197_v31  ;;  %v2181_v46 = vld [vmem:[#allocation7 + $0x770] sm:$0xff] }
 0x354   : > { %3770 = vmatpush1.bf16.msra.mxu1 %v4923_v40  ;;  %3730 = vmatprep.subr.bf16.mxu0 %v5042_v43  ;;  %v4995_v40 = vcombine.low %v2066_v32, %v2070_v12  ;;  %v5114_v43 = vcombine.high %v2185_v35, %v2189_v36  ;;  %v2137_v30 = vld [vmem:[#allocation7 + $0x610] sm:$0xff]  ;;  %v2010_v32 = vld [vmem:[#allocation7 + $0x218] sm:$0xff] }
 0x355   : > { %3771 = vmatprep.subr.bf16.mxu1 %v4916_v44  ;;  %v4988_v44 = vcombine.high %v2058_v37, %v2062_v38  ;;  %v2141_v31 = vld [vmem:[#allocation7 + $0x630] sm:$0xff]  ;;  %v2014_v12 = vld [vmem:[#allocation7 + $0x238] sm:$0xff] }
 0x357   : > { %3731 = vmatpush1.bf16.msra.mxu0 %v5041_v49  ;;  %v5113_v49 = vcombine.low %v2185_v35, %v2189_v36  ;;  %v2130_v35 = vld [vmem:[#allocation7 + $0x5d8] sm:$0xff] }
 0x358   : > { %3772 = vmatpush1.bf16.msra.mxu1 %v4915_v50  ;;  %3732 = vmatprep.subr.bf16.mxu0 %v5034_v51  ;;  %v4987_v50 = vcombine.low %v2058_v37, %v2062_v38  ;;  %v5106_v51 = vcombine.high %v2177_v45, %v2181_v46  ;;  %v2134_v36 = vld [vmem:[#allocation7 + $0x5f8] sm:$0xff]  ;;  %v5065_v37 = vcombine.low %v2137_v30, %v2141_v31 }
 0x359   : > { %3773 = vmatprep.subr.bf16.mxu1 %v4908_v52  ;;  %v4980_v52 = vcombine.high %v2050_v47, %v2054_v48  ;;  %v4939_v38 = vcombine.low %v2010_v32, %v2014_v12 }
 0x35b   : > { %3733 = vmatpush1.bf16.msra.mxu0 %v5033_v41  ;;  %v5105_v41 = vcombine.low %v2177_v45, %v2181_v46  ;;  %v5059_v45 = vcombine.low %v2130_v35, %v2134_v36 }
 0x35c   : > { %3774 = vmatpush1.bf16.msra.mxu1 %v4907_v16  ;;  %3734 = vmatprep.subr.bf16.mxu0 %v5026_v55  ;;  %v4979_v16 = vcombine.low %v2050_v47, %v2054_v48  ;;  %v5098_v55 = vcombine.high %v2169_v53, %v2173_v56  ;;  %v2114_v47 = vld [vmem:[#allocation7 + $0x558] sm:$0xff] }
 0x35d   : > { %3775 = vmatprep.subr.bf16.mxu1 %v4900_v20  ;;  %v4972_v20 = vcombine.high %v2042_v57, %v2046_v58  ;;  %v2118_v48 = vld [vmem:[#allocation7 + $0x578] sm:$0xff] }
 0x35f   : > { %3735 = vmatpush1.bf16.msra.mxu0 %v5025_v62  ;;  %v5097_v62 = vcombine.low %v2169_v53, %v2173_v56  ;;  %v5044_v56 = vcombine.high %v2114_v47, %v2118_v48 }
 0x360   : > { %3776 = vmatpush1.bf16.msra.mxu1 %v4899_v63  ;;  %3736 = vmatprep.subr.bf16.mxu0 %v5018_v0  ;;  %v4971_v63 = vcombine.low %v2042_v57, %v2046_v58  ;;  %v5090_v0 = vcombine.high %v2161_v59, %v2165_v54  ;;  %v2106_v57 = vld [vmem:[#allocation7 + $0x518] sm:$0xff] }
 0x361   : > { %3777 = vmatprep.subr.bf16.mxu1 %v4892_v1  ;;  %v4964_v1 = vcombine.high %v2034_v60, %v2038_v61  ;;  %v2110_v58 = vld [vmem:[#allocation7 + $0x538] sm:$0xff] }
 0x363   : > { %3737 = vmatpush1.bf16.msra.mxu0 %v5017_v8  ;;  %v5089_v8 = vcombine.low %v2161_v59, %v2165_v54  ;;  %v2098_v54 = vld [vmem:[#allocation7 + $0x4d8] sm:$0xff] }
 0x364   : > { %3778 = vmatpush1.bf16.msra.mxu1 %v4891_v9  ;;  %3738 = vmatprep.subr.bf16.mxu0 %v5010_v10  ;;  %v4963_v9 = vcombine.low %v2034_v60, %v2038_v61  ;;  %v5082_v10 = vcombine.high %v2153_v2, %v2157_v3  ;;  %v2102_v60 = vld [vmem:[#allocation7 + $0x4f8] sm:$0xff]  ;;  %v5665_v61 = vld [vmem:[#allocation8 + $0x60] sm:$0xff]  }
 0x365   : > { %3779 = vmatprep.subr.bf16.mxu1 %v4884_v11  ;;  %v4956_v11 = vcombine.high %v2026_v4, %v2030_v7 }
 0x367   : > { %3739 = vmatpush1.bf16.msra.mxu0 %v5009_v21  ;;  %v5081_v21 = vcombine.low %v2153_v2, %v2157_v3  ;;  %v5666_v2 = vld [vmem:[#allocation8 + $0x20] sm:$0xff]   ;;  %v5667_v3 = vld [vmem:[#allocation8 + $0x58] sm:$0xff]  }
 0x368   : > { %3780 = vmatpush1.bf16.msra.mxu1 %v4883_v22  ;;  %3740 = vmatprep.subr.bf16.mxu0 %v5002_v23  ;;  %v4955_v22 = vcombine.low %v2026_v4, %v2030_v7  ;;  %v5074_v23 = vcombine.high %v2145_v14, %v2149_v17  ;;  %v5027_v4 = vcombine.low %v2098_v54, %v2102_v60 }
 0x369   : > { %3781 = vmatprep.subr.bf16.mxu1 %v4876_v27  ;;  %v4948_v27 = vcombine.high %v2018_v18, %v2022_v19 }
 0x36b   : > { %3741 = vmatpush1.bf16.msra.mxu0 %v5001_v13  ;;  %v5073_v13 = vcombine.low %v2145_v14, %v2149_v17 }
 0x36c   : > { %3782 = vmatpush1.bf16.msra.mxu1 %v4875_v15  ;;  %3742 = vmatprep.subr.bf16.mxu0 %v5122_v33  ;;  %v4947_v15 = vcombine.low %v2018_v18, %v2022_v19  ;;  %v5066_v33 = vcombine.high %v2137_v30, %v2141_v31  ;;  %v2074_v18 = vld [vmem:[#allocation7 + $0x418] sm:$0xff] }
 0x36d   : > { %3783 = vmatprep.subr.bf16.mxu1 %v4996_v34  ;;  %v4940_v34 = vcombine.high %v2010_v32, %v2014_v12  ;;  %v2078_v19 = vld [vmem:[#allocation7 + $0x438] sm:$0xff]  ;;  %v5672_v32 = vld [vmem:[#allocation8 + $0x8] sm:$0xff]   ;;  %v5673_v12 = vld [vmem:[#allocation8 + $0x40] sm:$0xff]  }
 0x36e   : > { %v2194_v30 = vld [vmem:[#allocation7 + $0x7d8] sm:$0xff] }
 0x36f   : > { %3743 = vmatpush2.bf16.msra.mxu0 %v5121_v39  ;;  %v5060_v39 = vcombine.high %v2130_v35, %v2134_v36  ;;  %v2198_v31 = vld [vmem:[#allocation7 + $0x7f8] sm:$0xff]  ;;  %v5674_v35 = vld [vmem:[#allocation8] sm:$0xff]  }
 0x370   : > { %3784 = vmatpush2.bf16.msra.mxu1 %v4995_v40  ;;  %3744 = vmatprep.subr.bf16.mxu0 %v5114_v43  ;;  %v2122_v40 = vld [vmem:[#allocation7 + $0x598] sm:$0xff] }
 0x371   : > { %3785 = vmatprep.subr.bf16.mxu1 %v4988_v44  ;;  %v2126_v43 = vld [vmem:[#allocation7 + $0x5b8] sm:$0xff] }
 0x372   : > { %v5659_v44 = vld [vmem:[#allocation8 + $0x78] sm:$0xff]   ;;  %v5052_v46 = vcombine.high %v2122_v40, %v2126_v43 }
 0x373   : > { %3745 = vmatpush2.bf16.msra.mxu0 %v5113_v49  ;;  %v5660_v49 = vld [vmem:[#allocation8 + $0x38] sm:$0xff]  }
 0x374   : > { %3786 = vmatpush2.bf16.msra.mxu1 %v4987_v50  ;;  %3746 = vmatprep.subr.bf16.mxu0 %v5106_v51  ;;  %v5661_v51 = vld [vmem:[#allocation8 + $0x70] sm:$0xff]   ;;  %v5691_v36 = vld [vmem:[#allocation8 + $0x178] sm:$0xff]  }
 0x375   : > { %3787 = vmatprep.subr.bf16.mxu1 %v4980_v52  ;;  %v5051_v52 = vcombine.low %v2122_v40, %v2126_v43  ;;  %v2182_v40 = vld [vmem:[#allocation7 + $0x778] sm:$0xff] }
 0x377   : > { %3747 = vmatpush2.bf16.msra.mxu0 %v5105_v41  ;;  %v5662_v41 = vld [vmem:[#allocation8 + $0x30] sm:$0xff]  }
 0x378   : > { %3788 = vmatpush2.bf16.msra.mxu1 %v4979_v16  ;;  %3748 = vmatprep.subr.bf16.mxu0 %v5098_v55  ;;  %v5663_v55 = vld [vmem:[#allocation8 + $0x68] sm:$0xff]  }
 0x379   : > { %3789 = vmatprep.subr.bf16.mxu1 %v4972_v20  ;;  %v5043_v20 = vcombine.low %v2114_v47, %v2118_v48 }
 0x37b   : > { %3749 = vmatpush2.bf16.msra.mxu0 %v5097_v62  ;;  %v5035_v62 = vcombine.low %v2106_v57, %v2110_v58 }
 0x37c   : > { %3790 = vmatpush2.bf16.msra.mxu1 %v4971_v63  ;;  %3750 = vmatprep.subr.bf16.mxu0 %v5090_v0  ;;  %v5028_v63 = vcombine.high %v2098_v54, %v2102_v60  ;;  %v2090_v0 = vld [vmem:[#allocation7 + $0x498] sm:$0xff] }
 0x37d   : > { %3791 = vmatprep.subr.bf16.mxu1 %v4964_v1  ;;  %v2094_v1 = vld [vmem:[#allocation7 + $0x4b8] sm:$0xff] }
 0x37e   : > { %v5020_v7 = vcombine.high %v2090_v0, %v2094_v1  ;;  %v5019_v14 = vcombine.low %v2090_v0, %v2094_v1  ;;  %v2138_v54 = vld [vmem:[#allocation7 + $0x618] sm:$0xff] }
 0x37f   : > { %3751 = vmatpush2.bf16.msra.mxu0 %v5089_v8  ;;  %v2082_v8 = vld [vmem:[#allocation7 + $0x458] sm:$0xff] }
 0x380   : > { %3792 = vmatpush2.bf16.msra.mxu1 %v4963_v9  ;;  %3752 = vmatprep.subr.bf16.mxu0 %v5082_v10  ;;  %v2086_v9 = vld [vmem:[#allocation7 + $0x478] sm:$0xff] }
 0x381   : > { %3793 = vmatprep.subr.bf16.mxu1 %v4956_v11  ;;  %v5668_v10 = vld [vmem:[#allocation8 + $0x18] sm:$0xff]   ;;  %v5669_v11 = vld [vmem:[#allocation8 + $0x50] sm:$0xff]   ;;  %v5012_v17 = vcombine.high %v2082_v8, %v2086_v9 }
 0x382   : > { %v2142_v60 = vld [vmem:[#allocation7 + $0x638] sm:$0xff] }
 0x383   : > { %3753 = vmatpush2.bf16.msra.mxu0 %v5081_v21  ;;  %v5670_v21 = vld [vmem:[#allocation8 + $0x10] sm:$0xff]   ;;  %v5675_v0 = vld [vmem:[#allocation8 + $0xf8] sm:$0xff]  }
 0x384   : > { %3794 = vmatpush2.bf16.msra.mxu1 %v4955_v22  ;;  %3754 = vmatprep.subr.bf16.mxu0 %v5074_v23  ;;  %v5671_v22 = vld [vmem:[#allocation8 + $0x48] sm:$0xff]   ;;  %v5011_v23 = vcombine.low %v2082_v8, %v2086_v9 }
 0x385   : > { %3795 = vmatprep.subr.bf16.mxu1 %v4948_v27  ;;  %v5004_v27 = vcombine.high %v2074_v18, %v2078_v19 }
 0x387   : > { %3755 = vmatpush2.bf16.msra.mxu0 %v5073_v13  ;;  %v5003_v13 = vcombine.low %v2074_v18, %v2078_v19 }
 0x388   : > { %3796 = vmatpush2.bf16.msra.mxu1 %v4947_v15  ;;  %3756 = vmatprep.subr.bf16.mxu0 %v5066_v33  ;;  %v5124_v15 = vcombine.high %v2194_v30, %v2198_v31  ;;  %v2186_v33 = vld [vmem:[#allocation7 + $0x798] sm:$0xff] }
 0x389   : > { %3797 = vmatprep.subr.bf16.mxu1 %v4940_v34  ;;  %v2190_v34 = vld [vmem:[#allocation7 + $0x7b8] sm:$0xff] }
 0x38a   : > { %v5115_v43 = vcombine.low %v2186_v33, %v2190_v34 }
 0x38b   : > { %3757 = vmatpush2.bf16.msra.mxu0 %v5065_v37  ;;  %v5123_v37 = vcombine.low %v2194_v30, %v2198_v31  ;;  %v5681_v30 = vld [vmem:[#allocation8 + $0xe0] sm:$0xff]   ;;  %v5692_v31 = vld [vmem:[#allocation8 + $0x138] sm:$0xff]  }
 0x38c   : > { %3798 = vmatpush2.bf16.msra.mxu1 %v4939_v38  ;;  %3808 = vmatprep.subr.bf16.mxu0 %v5060_v39  ;;  %v5116_v38 = vcombine.high %v2186_v33, %v2190_v34  ;;  %v2178_v39 = vld [vmem:[#allocation7 + $0x758] sm:$0xff]  ;;  %v5694_v33 = vld [vmem:[#allocation8 + $0x130] sm:$0xff]   ;;  %v5695_v34 = vld [vmem:[#allocation8 + $0x168] sm:$0xff]  }
 0x38d   : > { %5194 = vmatprep.subr.bf16.mxu1 %v5659_v44  ;;  %v5108_v44 = vcombine.high %v2178_v39, %v2182_v40  ;;  %v5107_v47 = vcombine.low %v2178_v39, %v2182_v40  ;;  %v5686_v39 = vld [vmem:[#allocation8 + $0x90] sm:$0xff]   ;;  %v5687_v40 = vld [vmem:[#allocation8 + $0xc8] sm:$0xff]  }
 0x38e   : > { %3759 = vmatmul.mubr.bf16.vlgmr.msra.gmra.mxu0 %v6159_v6  ;;  %v6174_v50 = vpop.f32.mrf.mxu1 }
 0x38f   : > { %3800 = vmatmul.mubr.bf16.vlgmr.msra.gmra.mxu1 %v6145_v42  ;;  %3809 = vmatpush1.bf16.msra.mxu0 %v5059_v45  ;;  %v5036_v42 = vcombine.high %v2106_v57, %v2110_v58  ;;  %v2170_v45 = vld [vmem:[#allocation7 + $0x718] sm:$0xff] }
 0x390   : > { %3840 = vmatprep.mubr.bf16.mxu0 %v6157_v5  ;;  %v6178_v53 = vpop.f32.mrf.mxu1  ;;  %3810 = vmatprep.subr.bf16.mxu0 %v5052_v46  ;;  %v5664_v5 = vld [vmem:[#allocation8 + $0x28] sm:$0xff]   ;;  %v2174_v46 = vld [vmem:[#allocation7 + $0x738] sm:$0xff] }
 0x391   : > { %5195 = vmatpush3.bf16.msra.mxu1 %v5660_v49  ;;  %v5100_v48 = vcombine.high %v2170_v45, %v2174_v46  ;;  %v2162_v49 = vld [vmem:[#allocation7 + $0x6d8] sm:$0xff] }
 0x392   : > { %v3559_v16 = vpop.f32.mrf.mxu1  ;;  %5196 = vmatprep.subr.bf16.mxu1 %v5661_v51  ;;  %v2166_v51 = vld [vmem:[#allocation7 + $0x6f8] sm:$0xff] }
 0x393   : > { %3811 = vmatpush1.bf16.msra.mxu0 %v5051_v52  ;;  %v5099_v52 = vcombine.low %v2170_v45, %v2174_v46  ;;  %v2154_v57 = vld [vmem:[#allocation7 + $0x698] sm:$0xff]  ;;  %v5688_v45 = vld [vmem:[#allocation8 + $0x88] sm:$0xff]   ;;  %v5689_v46 = vld [vmem:[#allocation8 + $0xc0] sm:$0xff]  }
 0x394   : > { %v3560_v59 = vpop.f32.mrf.mxu1  ;;  %3812 = vmatprep.subr.bf16.mxu0 %v5044_v56  ;;  %v5092_v56 = vcombine.high %v2162_v49, %v2166_v51  ;;  %v2158_v58 = vld [vmem:[#allocation7 + $0x6b8] sm:$0xff] }
 0x395   : > { %5197 = vmatpush3.bf16.msra.mxu1 %v5662_v41  ;;  %v5091_v41 = vcombine.low %v2162_v49, %v2166_v51  ;;  %v5084_v16 = vcombine.high %v2154_v57, %v2158_v58  ;;  %v5083_v59 = vcombine.low %v2154_v57, %v2158_v58  ;;  %v5690_v49 = vld [vmem:[#allocation8 + $0x80] sm:$0xff]   ;;  %v5707_v51 = vld [vmem:[#allocation8 + $0x1f8] sm:$0xff]   ;;  %v5704_v57 = vld [vmem:[#allocation8 + $0x108] sm:$0xff]  }
 0x396   : > { %5198 = vmatprep.subr.bf16.mxu1 %v5663_v55  ;;  %v2146_v55 = vld [vmem:[#allocation7 + $0x658] sm:$0xff]  ;;  %v5705_v58 = vld [vmem:[#allocation8 + $0x140] sm:$0xff]  }
 0x397   : > { %3813 = vmatpush1.bf16.msra.mxu0 %v5043_v20  ;;  %v2150_v20 = vld [vmem:[#allocation7 + $0x678] sm:$0xff] }
 0x398   : > { %3814 = vmatprep.subr.bf16.mxu0 %v5036_v42  ;;  %v5076_v42 = vcombine.high %v2146_v55, %v2150_v20 }
 0x399   : > { %5199 = vmatpush3.bf16.msra.mxu1 %v5664_v5  ;;  %v5075_v5 = vcombine.low %v2146_v55, %v2150_v20 }
 0x39a   : > { %5200 = vmatprep.subr.bf16.mxu1 %v5665_v61  ;;  %v5068_v61 = vcombine.high %v2138_v54, %v2142_v60 }
 0x39b   : > { %3815 = vmatpush1.bf16.msra.mxu0 %v5035_v62  ;;  %v6183_v62 = vld [vmem:[%s6260_s7] sm:$0xff] }
 0x39c   : > { %3816 = vmatprep.subr.bf16.mxu0 %v5028_v63  ;;  %v5067_v63 = vcombine.low %v2138_v54, %v2142_v60  ;;  %v2204_v1 = vrot.slane %v6183_v62, %v6092_v25  ;;  %v2216_v55 = vrot.slane %v6183_v62, %v6104_v29  ;;  %v5709_v29 = vld [vmem:[#allocation8 + $0x1f0] sm:$0xff]  }
 0x39d   : > { %5201 = vmatpush3.bf16.msra.mxu1 %v5666_v2  ;;  %v2208_v2 = vrot.slane %v6183_v62, %v6101_v28  ;;  %v5679_v28 = vld [vmem:[#allocation8 + $0xe8] sm:$0xff]  }
 0x39e   : > { %5202 = vmatprep.subr.bf16.mxu1 %v5667_v3  ;;  %v5676_v3 = vld [vmem:[#allocation8 + $0xb8] sm:$0xff]  }
 0x39f   : > { %3817 = vmatpush1.bf16.msra.mxu0 %v5027_v4  ;;  %v5677_v4 = vld [vmem:[#allocation8 + $0xf0] sm:$0xff]  }
 0x3a0   : > { %3818 = vmatprep.subr.bf16.mxu0 %v5020_v7  ;;  %v3556_v7 = vadd.f32 %v6174_v50, %v2204_v1 }
 0x3a1   : > { %5203 = vmatpush3.bf16.msra.mxu1 %v5668_v10  ;;  %v3558_v10 = vadd.f32 %v6178_v53, %v2208_v2 }
 0x3a2   : > { %5204 = vmatprep.subr.bf16.mxu1 %v5669_v11 }
 0x3a3   : > { %3819 = vmatpush1.bf16.msra.mxu0 %v5019_v14  ;;  %v5678_v14 = vld [vmem:[#allocation8 + $0xb0] sm:$0xff]  }
 0x3a4   : > { %3820 = vmatprep.subr.bf16.mxu0 %v5012_v17 }
 0x3a5   : > { %5205 = vmatpush3.bf16.msra.mxu1 %v5670_v21 }
 0x3a6   : > { %5206 = vmatprep.subr.bf16.mxu1 %v5671_v22 }
 0x3a7   : > { %3821 = vmatpush1.bf16.msra.mxu0 %v5011_v23 }
 0x3a8   : > { %3822 = vmatprep.subr.bf16.mxu0 %v5004_v27 }
 0x3a9   : > { %5207 = vmatpush3.bf16.msra.mxu1 %v5672_v32 }
 0x3aa   : > { %5208 = vmatprep.subr.bf16.mxu1 %v5673_v12  ;;  %v5693_v12 = vld [vmem:[#allocation8 + $0x170] sm:$0xff]  }
 0x3ab   : > { %3823 = vmatpush1.bf16.msra.mxu0 %v5003_v13  ;;  %v5682_v13 = vld [vmem:[#allocation8 + $0xa0] sm:$0xff]  }
 0x3ac   : > { %3824 = vmatprep.subr.bf16.mxu0 %v5124_v15  ;;  %v5683_v15 = vld [vmem:[#allocation8 + $0xd8] sm:$0xff]  }
 0x3ad   : > { %5209 = vmatpush3.bf16.msra.mxu1 %v5674_v35  ;;  %v5684_v35 = vld [vmem:[#allocation8 + $0x98] sm:$0xff]  }
 0x3ae   : > { %5238 = vmatprep.subr.bf16.mxu1 %v5691_v36  ;;  %v5685_v36 = vld [vmem:[#allocation8 + $0xd0] sm:$0xff]  }
 0x3af   : > { %3825 = vmatpush2.bf16.msra.mxu0 %v5123_v37  ;;  %v5696_v37 = vld [vmem:[#allocation8 + $0x128] sm:$0xff]  }
 0x3b0   : > { %3826 = vmatprep.subr.bf16.mxu0 %v5116_v38  ;;  %v5697_v38 = vld [vmem:[#allocation8 + $0x160] sm:$0xff]  }
 0x3b3   : > { %3827 = vmatpush2.bf16.msra.mxu0 %v5115_v43  ;;  %v5698_v43 = vld [vmem:[#allocation8 + $0x120] sm:$0xff]  }
 0x3b4   : > { %3828 = vmatprep.subr.bf16.mxu0 %v5108_v44  ;;  %v5699_v44 = vld [vmem:[#allocation8 + $0x158] sm:$0xff]  }
 0x3b7   : > { %3829 = vmatpush2.bf16.msra.mxu0 %v5107_v47  ;;  %v5700_v47 = vld [vmem:[#allocation8 + $0x118] sm:$0xff]  }
 0x3b8   : > { %3830 = vmatprep.subr.bf16.mxu0 %v5100_v48  ;;  %v5701_v48 = vld [vmem:[#allocation8 + $0x150] sm:$0xff]  }
 0x3bb   : > { %3831 = vmatpush2.bf16.msra.mxu0 %v5099_v52  ;;  %v5702_v52 = vld [vmem:[#allocation8 + $0x110] sm:$0xff]  }
 0x3bc   : > { %3832 = vmatprep.subr.bf16.mxu0 %v5092_v56  ;;  %v5703_v56 = vld [vmem:[#allocation8 + $0x148] sm:$0xff]  }
 0x3bf   : > { %3833 = vmatpush2.bf16.msra.mxu0 %v5091_v41  ;;  %v5706_v41 = vld [vmem:[#allocation8 + $0x100] sm:$0xff]  }
 0x3c0   : > { %3834 = vmatprep.subr.bf16.mxu0 %v5084_v16  ;;  %v2212_v16 = vrot.slane %v6183_v62, %v6095_v26 }
 0x3c3   : > { %3835 = vmatpush2.bf16.msra.mxu0 %v5083_v59 }
 0x3c4   : > { %3836 = vmatprep.subr.bf16.mxu0 %v5076_v42 }
 0x3c7   : > { %3837 = vmatpush2.bf16.msra.mxu0 %v5075_v5 }
 0x3c8   : > { %3838 = vmatprep.subr.bf16.mxu0 %v5068_v61 }
 0x3cb   : > { %3839 = vmatpush2.bf16.msra.mxu0 %v5067_v63 }
 0x3cc   : > { %5216 = vmatprep.subr.bf16.mxu0 %v5675_v0 }
 0x3ce   : > { %3841 = vmatmul.mubr.bf16.vlgmr.msra.gmra.mxu0 %v6159_v6  ;;  %v3596_v8 = vpop.f32.mrf.mxu0  ;;  %v6191_v9 = vpop.f32.mrf.mxu1  ;;  %v5680_v6 = vld [vmem:[#allocation8 + $0xa8] sm:$0xff]  }
 0x3cf   : > { %v3597_v11 = vadd.f32 %v3596_v8, %v3556_v7  ;;  %5217 = vmatpush3.bf16.msra.mxu0 %v5676_v3  ;;  %v3638_v20 = vadd.f32 %v6191_v9, %v2212_v16  ;;  %v5708_v8 = vld [vmem:[#allocation8 + $0x1b8] sm:$0xff]   ;;  %v5710_v9 = vld [vmem:[#allocation8 + $0x1b0] sm:$0xff]  }
 0x3d0   : > { %v3598_v25 = vpop.f32.mrf.mxu0  ;;  %v6194_v17 = vpop.f32.mrf.mxu1  ;;  %5218 = vmatprep.subr.bf16.mxu0 %v5677_v4 }
 0x3d1   : > { %v3599_v18 = vadd.f32 %v3598_v25, %v3558_v10  ;;  %v3849_v19 = vmax.f32 %v3597_v11, 0.0  ;;  %v3640_v42 = vadd.f32 %v6194_v17, %v2216_v55  ;;  %v5711_v11 = vld [vmem:[#allocation8 + $0x1e8] sm:$0xff]   ;;  %v5713_v25 = vld [vmem:[#allocation8 + $0x1e0] sm:$0xff]  }
 0x3d2   : > { %v3600_v21 = vpop.f32.mrf.mxu0  ;;  %v3641_v22 = vpop.f32.mrf.mxu1  ;;  %v5714_v17 = vld [vmem:[#allocation8 + $0x1a0] sm:$0xff]  }
 0x3d3   : > { %v3850_v50 = vmax.f32 %v3599_v18, 0.0  ;;  %5219 = vmatpush3.bf16.msra.mxu0 %v5678_v14  ;;  %v3857_v32 = vpack.c.bf16 %v3849_v19, %v3849_v19  ;;  %v5712_v14 = vld [vmem:[#allocation8 + $0x1a8] sm:$0xff]   ;;  %v5716_v18 = vld [vmem:[#allocation8 + $0x198] sm:$0xff]   ;;  %v5717_v19 = vld [vmem:[#allocation8 + $0x1d0] sm:$0xff]  }
 0x3d4   : > { %v3601_v23 = vpop.f32.mrf.mxu0  ;;  %v3642_v27 = vpop.f32.mrf.mxu1  ;;  %5220 = vmatprep.subr.bf16.mxu0 %v5679_v28  ;;  %v5715_v28 = vld [vmem:[#allocation8 + $0x1d8] sm:$0xff]   ;;  %v5718_v21 = vld [vmem:[#allocation8 + $0x190] sm:$0xff]   ;;  %v5719_v22 = vld [vmem:[#allocation8 + $0x1c8] sm:$0xff]  }
 0x3d5   : > { %v3858_v53 = vpack.c.bf16 %v3850_v50, %v3850_v50  ;;  %v5720_v50 = vld [vmem:[#allocation8 + $0x188] sm:$0xff]   ;;  %v5722_v23 = vld [vmem:[#allocation8 + $0x180] sm:$0xff]   ;;  %v2219_v27 = vsub.s32 4, %v6089_v24 }
 0x3d7   : > { %4416 = vmatprep.mubr.bf16.mxu1 %v3858_v53  ;;  %5221 = vmatpush3.bf16.msra.mxu0 %v5680_v6  ;;  %v5721_v6 = vld [vmem:[#allocation8 + $0x1c0] sm:$0xff]   ;;  %v2220_v53 = vrot.slane %v6183_v62, %v2219_v27 }
 0x3d8   : > { %4417 = vmatmul.mubr.bf16.vlgmr.msra.gmra.mxu1 %v3857_v32  ;;  %5222 = vmatprep.subr.bf16.mxu0 %v5681_v30  ;;  %v2223_v30 = vsub.s32 5, %v6089_v24 }
 0x3d9   : > { %5239 = vmatpush3.bf16.msra.mxu1 %v5692_v31 }
 0x3da   : > { %5240 = vmatprep.subr.bf16.mxu1 %v5693_v12  ;;  %v2224_v31 = vrot.slane %v6183_v62, %v2223_v30 }
 0x3db   : > { %5223 = vmatpush3.bf16.msra.mxu0 %v5682_v13 }
 0x3dc   : > { %5224 = vmatprep.subr.bf16.mxu0 %v5683_v15 }
 0x3dd   : > { %5241 = vmatpush3.bf16.msra.mxu1 %v5694_v33 }
 0x3de   : > { %5242 = vmatprep.subr.bf16.mxu1 %v5695_v34 }
 0x3df   : > { %5225 = vmatpush3.bf16.msra.mxu0 %v5684_v35 }
 0x3e0   : > { %5226 = vmatprep.subr.bf16.mxu0 %v5685_v36 }
 0x3e1   : > { %5243 = vmatpush3.bf16.msra.mxu1 %v5696_v37 }
 0x3e2   : > { %5244 = vmatprep.subr.bf16.mxu1 %v5697_v38 }
 0x3e3   : > { %5227 = vmatpush3.bf16.msra.mxu0 %v5686_v39 }
 0x3e4   : > { %5228 = vmatprep.subr.bf16.mxu0 %v5687_v40 }
 0x3e5   : > { %5245 = vmatpush3.bf16.msra.mxu1 %v5698_v43 }
 0x3e6   : > { %5246 = vmatprep.subr.bf16.mxu1 %v5699_v44 }
 0x3e7   : > { %5229 = vmatpush3.bf16.msra.mxu0 %v5688_v45 }
 0x3e8   : > { %5230 = vmatprep.subr.bf16.mxu0 %v5689_v46 }
 0x3e9   : > { %5247 = vmatpush3.bf16.msra.mxu1 %v5700_v47  ;;  %v2227_v47 = vsub.s32 6, %v6089_v24 }
 0x3ea   : > { %5248 = vmatprep.subr.bf16.mxu1 %v5701_v48  ;;  %v2231_v48 = vsub.s32 7, %v6089_v24 }
 0x3eb   : > { %5231 = vmatpush3.bf16.msra.mxu0 %v5690_v49  ;;  %v2228_v49 = vrot.slane %v6183_v62, %v2227_v47 }
 0x3ec   : > { %5260 = vmatprep.subr.bf16.mxu0 %v5707_v51  ;;  %v2232_v51 = vrot.slane %v6183_v62, %v2231_v48 }
 0x3ed   : > { %5249 = vmatpush3.bf16.msra.mxu1 %v5702_v52 }
 0x3ee   : > { %5250 = vmatprep.subr.bf16.mxu1 %v5703_v56 }
 0x3f1   : > { %5251 = vmatpush3.bf16.msra.mxu1 %v5704_v57 }
 0x3f2   : > { %5252 = vmatprep.subr.bf16.mxu1 %v5705_v58 }
 0x3f5   : > { %5253 = vmatpush3.bf16.msra.mxu1 %v5706_v41 }
 0x40e   : > { %v3678_v59 = vpop.f32.mrf.mxu0 }
 0x40f   : > { %v3679_v54 = vadd.f32 %v3678_v59, %v3638_v20  ;;  %v3719_v60 = vpop.f32.mrf.mxu1 }
 0x410   : > { %v3680_v5 = vpop.f32.mrf.mxu0  ;;  %v3720_v32 = vadd.f32 %v3719_v60, %v2220_v53 }
 0x411   : > { %v3681_v61 = vadd.f32 %v3680_v5, %v3640_v42  ;;  %v3721_v63 = vpop.f32.mrf.mxu1  ;;  %v3851_v0 = vmax.f32 %v3679_v54, 0.0 }
 0x412   : > { %v3682_v1 = vpop.f32.mrf.mxu0  ;;  %v3722_v13 = vadd.f32 %v3721_v63, %v2224_v31 }
 0x413   : > { %v3852_v2 = vmax.f32 %v3681_v61, 0.0  ;;  %v3723_v3 = vpop.f32.mrf.mxu1  ;;  %v3859_v10 = vpack.c.bf16 %v3851_v0, %v3851_v0  ;;  %v5125_v0 = vld [vmem:[%s6262_s9] ss:$0 sm:$0xff] }
 0x414   : > { %v3683_v4 = vpop.f32.mrf.mxu0 }
 0x415   : > { %v3860_v7 = vpack.c.bf16 %v3852_v2, %v3852_v2  ;;  %v3724_v26 = vpop.f32.mrf.mxu1 }
 0x417   : > { %4456 = vmatprep.mubr.bf16.mxu0 %v3860_v7 }
 0x418   : > { %4457 = vmatmul.mubr.bf16.vlgmr.msra.gmra.mxu0 %v3859_v10 }
 0x419   : > { %5261 = vmatpush3.bf16.msra.mxu0 %v5708_v8 }
 0x41a   : > { %5262 = vmatprep.subr.bf16.mxu0 %v5709_v29 }
 0x41d   : > { %5263 = vmatpush3.bf16.msra.mxu0 %v5710_v9 }
 0x41e   : > { %5264 = vmatprep.subr.bf16.mxu0 %v5711_v11 }
 0x421   : > { %5265 = vmatpush3.bf16.msra.mxu0 %v5712_v14 }
 0x422   : > { %5266 = vmatprep.subr.bf16.mxu0 %v5713_v25 }
 0x425   : > { %5267 = vmatpush3.bf16.msra.mxu0 %v5714_v17 }
 0x426   : > { %5268 = vmatprep.subr.bf16.mxu0 %v5715_v28 }
 0x429   : > { %5269 = vmatpush3.bf16.msra.mxu0 %v5716_v18 }
 0x42a   : > { %5270 = vmatprep.subr.bf16.mxu0 %v5717_v19 }
 0x42d   : > { %5271 = vmatpush3.bf16.msra.mxu0 %v5718_v21 }
 0x42e   : > { %5272 = vmatprep.subr.bf16.mxu0 %v5719_v22 }
 0x431   : > { %5273 = vmatpush3.bf16.msra.mxu0 %v5720_v50 }
 0x432   : > { %5274 = vmatprep.subr.bf16.mxu0 %v5721_v6 }
 0x435   : > { %5275 = vmatpush3.bf16.msra.mxu0 %v5722_v23 }
 0x44e   : > { %v3760_v12 = vpop.f32.mrf.mxu0 }
 0x44f   : > { %v3761_v15 = vadd.f32 %v3760_v12, %v3720_v32  ;;  %v3801_v33 = vpop.f32.mrf.mxu1 }
 0x450   : > { %v3762_v34 = vpop.f32.mrf.mxu0  ;;  %v3802_v52 = vadd.f32 %v3801_v33, %v2228_v49 }
 0x451   : > { %v3763_v35 = vadd.f32 %v3762_v34, %v3722_v13  ;;  %v3803_v36 = vpop.f32.mrf.mxu1  ;;  %v3853_v37 = vmax.f32 %v3761_v15, 0.0 }
 0x452   : > { %v3764_v38 = vpop.f32.mrf.mxu0  ;;  %v3804_v57 = vadd.f32 %v3803_v36, %v2232_v51 }
 0x453   : > { %v3854_v39 = vmax.f32 %v3763_v35, 0.0  ;;  %v3805_v40 = vpop.f32.mrf.mxu1  ;;  %v3861_v46 = vpack.c.bf16 %v3853_v37, %v3853_v37 }
 0x454   : > { %v3765_v43 = vpop.f32.mrf.mxu0 }
 0x455   : > { %v3862_v44 = vpack.c.bf16 %v3854_v39, %v3854_v39  ;;  %v3806_v45 = vpop.f32.mrf.mxu1 }
 0x457   : > { %4496 = vmatprep.mubr.bf16.mxu1 %v3862_v44 }
 0x458   : > { %4497 = vmatmul.mubr.bf16.vlgmr.msra.gmra.mxu1 %v3861_v46 }
 0x48e   : > { %v3842_v56 = vpop.f32.mrf.mxu0 }
 0x48f   : > { %v3843_v58 = vadd.f32 %v3842_v56, %v3802_v52 }
 0x490   : > { %v3844_v41 = vpop.f32.mrf.mxu0 }
 0x491   : > { %v3845_v16 = vadd.f32 %v3844_v41, %v3804_v57  ;;  %v3855_v55 = vmax.f32 %v3843_v58, 0.0 }
 0x492   : > { %v3846_v20 = vpop.f32.mrf.mxu0 }
 0x493   : > { %v3856_v59 = vmax.f32 %v3845_v16, 0.0  ;;  %v3863_v60 = vpack.c.bf16 %v3855_v55, %v3855_v55 }
 0x494   : > { %v3847_v42 = vpop.f32.mrf.mxu0 }
 0x495   : > { %v3864_v54 = vpack.c.bf16 %v3856_v59, %v3856_v59 }
 0x497   : > { %4536 = vmatprep.mubr.bf16.mxu0 %v3864_v54 }
 0x498   : > { %4537 = vmatmul.mubr.bf16.vlgmr.msra.gmra.mxu0 %v3863_v60  ;;  %v5210_v5 = vpop.f32.mrf.mxu1 }
 0x49a   : > { %v5211_v24 = vpop.f32.mrf.mxu1 }
 0x49b   : > { %v5212_v61 = vadd.f32 %v5211_v24, %v5210_v5 }
 0x49c   : > { %v5213_v63 = vpop.f32.mrf.mxu1 }
 0x49d   : > { %v4419_v3 = vadd.f32 %v5212_v61, %v5125_v0 }
 0x49e   : > { %v5214_v62 = vpop.f32.mrf.mxu1 }
 0x4d8   : > { %v5232_v1 = vpop.f32.mrf.mxu0 }
 0x4da   : > { %v5233_v2 = vpop.f32.mrf.mxu0 }
 0x4db   : > { %v5234_v4 = vadd.f32 %v5233_v2, %v5232_v1 }
 0x4dc   : > { %v5235_v7 = vpop.f32.mrf.mxu0 }
 0x4dd   : > { %v4459_v26 = vadd.f32 %v5234_v4, %v4419_v3 }
 0x4de   : > { %v5236_v8 = vpop.f32.mrf.mxu0 }
 0x518   : > { %v5254_v10 = vpop.f32.mrf.mxu1 }
 0x51a   : > { %v5255_v29 = vpop.f32.mrf.mxu1 }
 0x51b   : > { %v5256_v9 = vadd.f32 %v5255_v29, %v5254_v10 }
 0x51c   : > { %v5257_v11 = vpop.f32.mrf.mxu1 }
 0x51d   : > { %v4499_v14 = vadd.f32 %v5256_v9, %v4459_v26 }
 0x51e   : > { %v5258_v25 = vpop.f32.mrf.mxu1 }
 0x558   : > { %v5276_v17 = vpop.f32.mrf.mxu0 }
 0x55a   : > { %v5277_v28 = vpop.f32.mrf.mxu0 }
 0x55b   : > { %v5278_v18 = vadd.f32 %v5277_v28, %v5276_v17 }
 0x55c   : > { %v5279_v19 = vpop.f32.mrf.mxu0 }
 0x55d   : > { %v4539_v21 = vadd.f32 %v5278_v18, %v4499_v14 }
 0x55e   : > { %v5280_v22 = vpop.f32.mrf.mxu0 }
 0x55f   : > { %4544 = vst [vmem:[%s409_s20] sm:$0xff] %v4539_v21 }
 0x560   : > { %5844 = shalt.err (!%p5841_p8)
}
 0x561   : > { %s5845_s11 = scalar_lea.hbm %s6218_s22, 128  ;;  %s5849_s20 = scalar_lea.hbm %s6263_s10, 256 }
 0x562   : > { %p5846_p13 = scmp.ne.s32.totalorder %s6218_s22, %s5845_s11  ;;  %p5850_p6 = scmp.lt.s32.totalorder %s6218_s22, %s6263_s10 }
 0x563   : > { %p5851_p12 = scmp.lt.s32.totalorder %s5849_s20, %s5845_s11 }
 0x564   : > { %p5847_p11 = pnand %p5846_p13, %p6277_p1 }
 0x565   : > { %p5852_p10 = por %p5851_p12, %p5850_p6 }
 0x566   : > { %p5848_p0 = pneg %p5847_p11 }
 0x568   : > { %p5853_p9 = pnand %p5852_p10, %p5848_p0 }
 0x56a   : > { %5856 = shalt.err (!%p5853_p9)
}
 0x56b   : > { %5298 = dma.vmem_to_hbm [thread:$0]  (%p6277_p1), %s4560_s21, 128, %s6218_s22, %s4546_s12  }
 0x56c PF: > { %p5325_p3 = scmp.ge.s32.totalorder %s5903_s16, 2  ;;  %s4571_s25 = sand.u32 1, %s5891_s13  }
 0x56d   : > { %p6278_p5 = scmp.ne.s32.totalorder %s6268_s24, 0  ;;  %s4572_s17 = scalar_lea.sflag [#allocation4], %s4571_s25 }
 0x56f   : > { %p5314_p2 = pnand %p5325_p3, %p6278_p5 }
 0x571   : > { %p5315_p4 = pneg %p5314_p2 }
 0x573   : > { %5886 = dma.done.wait (%p5315_p4), %s4572_s17, 128  }
 0x574   : > { %5888 = vsyncadd (%p5315_p4), %s4572_s17, 4294967168  ;;  %s6279_s28 = sld [smem:[#allocation15_spill]]  ;;  %p23_p7 = scmp.ge.s32.totalorder %s5997_s19, 4  }
 0x575   : > { %s6280_s13 = smov %s5895_s14  ;;  %s6281_s14 = smov %s5899_s15 }
 0x576   : > { %s6283_s16 = smov %s5997_s19  ;;  %25 = sbr.rel (!%p23_p7) target bundleno = 6 (0x6), region = 112 }
 0x57a   : > { %s6282_s15 = smov %s6279_s28 }
 0x57b   :  { %4577 = vsyncpa [#allocation3], 1 }
 0x57c   :  { %4579 = vsyncpa [#allocation3 + $0x1], 1 }
 0x57d   :  { %4580 = vsyncpa [#allocation6], 1 }
 0x57e   :  { %4581 = vsyncpa [#allocation9], 1 }
 0x57f   :  { %4582 = vsyncpa [#allocation4], 1 }
 0x580   :  { %4584 = vsyncpa [#allocation4 + $0x1], 1 }

</bundles_post_ra>
